<compile_context>
chip_gen: v7x
topology: tpu7x:2x2x1
jax: 0.10.0
libtpu: 0.0.40
codegen_flags: <defaults>
</compile_context>

<pallas_src>
import functools

import jax
import jax.numpy as jnp
from jax.experimental import pallas as pl
from jax.experimental.pallas import tpu as pltpu

NEG_SLOPE = 0.01  # PyTorch nn.LeakyReLU default
N_FEAT = 188      # 183 feature columns + 5 "rest" columns
N_OUT = 6


def _leaky_relu(x):
    return jnp.where(x > 0, x, NEG_SLOPE * x)


def _round_up(n, m):
    return ((n + m - 1) // m) * m


# --------------------------------------------------------------------------- #
# Kernel                                                                      #
# --------------------------------------------------------------------------- #
def net_kernel(
    x_ref,                     # (TM, 188) bf16
    wf1_ref, b1_ref,           # fused first matmul: (188,160) bf16, (1,128) f32
    w2_ref, b2_ref,            # dense_layer_2 (128,64) bf16, (1,64) f32
    w3_ref, b3_ref,            # dense_layer_3 (64,32)  bf16, (1,32) f32
    w4o_ref, b4_ref,           # dense_layer_4 out_3 part (32,32) bf16, (1,32) f32
    w5_ref, b5_ref,            # dense_layer_5 (32,16) bf16, (1,16) f32
    w6_ref, b6_ref,            # dense_layer_6 (16,8)  bf16, (1,8) f32
    wf_ref, bf_ref,            # dense_layer_final (8,6) bf16, (1,6) f32
    o_ref,                     # (TM, 6) f32
):
    bf16 = jnp.bfloat16
    x = x_ref[...]  # (TM, 188) bf16

    # One wide MXU pass: embeddings + cat1 + dense_layer_1 AND the `rest`
    # contribution of dense_layer_4 (cols 128:160). x dies after this dot.
    y = jnp.dot(x, wf1_ref[...], preferred_element_type=jnp.float32)  # (TM, 160)
    h1 = jnp.tanh(y[:, 0:128] + b1_ref[...])                          # (TM, 128)
    rest_c = y[:, 128:160]                                            # (TM, 32)

    h2 = jnp.tanh(jnp.dot(h1.astype(bf16), w2_ref[...],
                          preferred_element_type=jnp.float32) + b2_ref[...])
    h3 = jnp.tanh(jnp.dot(h2.astype(bf16), w3_ref[...],
                          preferred_element_type=jnp.float32) + b3_ref[...])

    # dense_layer_4 without concatenate: rest contribution already in rest_c.
    h4 = _leaky_relu(jnp.dot(h3.astype(bf16), w4o_ref[...],
                             preferred_element_type=jnp.float32)
                     + rest_c + b4_ref[...])
    h5 = _leaky_relu(jnp.dot(h4.astype(bf16), w5_ref[...],
                             preferred_element_type=jnp.float32) + b5_ref[...])
    h6 = _leaky_relu(jnp.dot(h5.astype(bf16), w6_ref[...],
                             preferred_element_type=jnp.float32) + b6_ref[...])

    o_ref[...] = (jnp.dot(h6.astype(bf16), wf_ref[...],
                          preferred_element_type=jnp.float32) + bf_ref[...])


# --------------------------------------------------------------------------- #
# Parameter construction / fusion (done once, outside the kernel)             #
# --------------------------------------------------------------------------- #
def init_params(key):
    """Deterministic PyTorch-style (uniform +-1/sqrt(fan_in)) init.

    Returns a flat list [w, b, ...] where w is (in, out) and b is (1, out),
    in the original (unfused) module layout, all float32.
    """
    layer_dims = [
        (48, 32),    # period_embed
        (7, 4),      # weekday_embed
        (31, 16),    # day_embed
        (12, 8),     # month_embed
        (15, 8),     # peak_embed
        (13, 8),     # special_day_embed
        (53, 32),    # street_type_embed
        (4, 2),      # street_level_embed
        (110, 128),  # dense_layer_1
        (128, 64),   # dense_layer_2
        (64, 32),    # dense_layer_3
        (37, 32),    # dense_layer_4 (5 rest + 32)
        (32, 16),    # dense_layer_5
        (16, 8),     # dense_layer_6
        (8, 6),      # dense_layer_final
    ]
    params = []
    for i, (fan_in, fan_out) in enumerate(layer_dims):
        kw, kb = jax.random.split(jax.random.fold_in(key, i))
        bound = 1.0 / (fan_in ** 0.5)
        w = jax.random.uniform(kw, (fan_in, fan_out), jnp.float32, -bound, bound)
        b = jax.random.uniform(kb, (1, fan_out), jnp.float32, -bound, bound)
        params.extend([w, b])
    return params


def fuse_params(params):
    """Fold 8 embedding linears + cat1 into dense_layer_1, fold dense_layer_4's
    `rest` rows into the same fused matmul (cols 128:160), cast weights to bf16.

    Input column layout:  special_day[0:13], peak[13:28], month[28:40], day[40:71],
    weekday[71:78], period[78:126], street_level[126:130], street_type[130:183],
    rest[183:188].
    cat1 order: period(32) weekday(4) day(16) month(8) peak(8) special_day(8)
                street_type(32) street_level(2)  -> 110 columns.
    """
    (w_per, b_per, w_wd, b_wd, w_day, b_day, w_mo, b_mo,
     w_pk, b_pk, w_sd, b_sd, w_st, b_st, w_sl, b_sl,
     w1, b1, w2, b2, w3, b3, w4, b4, w5, b5, w6, b6, wf, bf) = params

    # Block-diagonal map from raw input columns -> cat1 space (110 cols).
    W_big = jnp.zeros((N_FEAT, 110), jnp.float32)
    W_big = W_big.at[78:126,    0:32 ].set(w_per)   # period
    W_big = W_big.at[71:78,    32:36 ].set(w_wd)    # weekday
    W_big = W_big.at[40:71,    36:52 ].set(w_day)   # day
    W_big = W_big.at[28:40,    52:60 ].set(w_mo)    # month
    W_big = W_big.at[13:28,    60:68 ].set(w_pk)    # peak
    W_big = W_big.at[0:13,     68:76 ].set(w_sd)    # special_day
    W_big = W_big.at[130:183,  76:108].set(w_st)    # street_type
    W_big = W_big.at[126:130, 108:110].set(w_sl)    # street_level
    b_cat1 = jnp.concatenate(
        (b_per, b_wd, b_day, b_mo, b_pk, b_sd, b_st, b_sl), axis=1)   # (1, 110)

    w1_fold = W_big @ w1            # (188, 128)
    b1_fold = b_cat1 @ w1 + b1      # (1, 128)

    # dense_layer_4 split: rows 0:5 act on `rest` (input cols 183:188); fold them
    # into extra output columns 128:160 of the fused first matmul. Rows 5:37 act
    # on out_3 and stay as a separate (32,32) matmul.
    w4_rest = jnp.zeros((N_FEAT, 32), jnp.float32).at[183:188, :].set(w4[0:5, :])
    w4_out3 = w4[5:37, :]

    w_fused_wide = jnp.concatenate((w1_fold, w4_rest), axis=1)   # (188, 160)

    bf16 = jnp.bfloat16
    return (
        w_fused_wide.astype(bf16), b1_fold,
        w2.astype(bf16), b2,
        w3.astype(bf16), b3,
        w4_out3.astype(bf16), b4,
        w5.astype(bf16), b5,
        w6.astype(bf16), b6,
        wf.astype(bf16), bf,
    )


# --------------------------------------------------------------------------- #
# Wrapper                                                                     #
# --------------------------------------------------------------------------- #
@functools.partial(jax.jit, static_argnames=("block_m",))
def net_forward(x, fused_params, *, block_m=2048):
    B, F = x.shape
    x = x.astype(jnp.bfloat16)   # halve the dominant HBM read stream

    # Batch tile: multiple of 16 sublanes (bf16 packing); big by default to
    # amortize the ~0.35 us/grid-step overhead, capped so the working set stays
    # well under v7x's 32 MiB scoped VMEM.
    tm = min(block_m, _round_up(B, 16))
    # Guarantee >= 2 grid steps when B allows so ("parallel",) shards the batch
    # across both TensorCores on v7x (no-op for v5e/v6e).
    if B > 16 and pl.cdiv(B, tm) < 2:
        tm = max(16, _round_up(pl.cdiv(B, 2), 16))
    grid = (pl.cdiv(B, tm),)

    x_spec = pl.BlockSpec((tm, F), lambda i: (i, 0))
    out_spec = pl.BlockSpec((tm, N_OUT), lambda i: (i, 0))
    # Weights/biases: full-array blocks, constant block index -> fetched once,
    # stay VMEM-resident across grid steps (~0.1 MB total in bf16).
    w_specs = [pl.BlockSpec(p.shape, lambda i: (0, 0)) for p in fused_params]

    param_bytes = sum(int(p.size) * p.dtype.itemsize for p in fused_params)
    flops = 2 * B * (188 * 160 + 128 * 64 + 64 * 32 + 32 * 32
                     + 32 * 16 + 16 * 8 + 8 * 6)
    cost = pl.CostEstimate(
        flops=int(flops),
        transcendentals=int(B * (128 + 64 + 32)),
        bytes_accessed=int(B * F * 2 + B * N_OUT * 4 + param_bytes),
    )

    # TODO(synk): at TM >= 4096 an in-kernel sub-chunk loop (lax.fori_loop over
    # row chunks) would further shrink the compute working set on v7x; at the
    # default TM=2048 the temporaries are ~5 MB so it is not needed.
    return pl.pallas_call(
        net_kernel,
        out_shape=jax.ShapeDtypeStruct((B, N_OUT), jnp.float32),
        grid=grid,
        in_specs=[x_spec] + w_specs,
        out_specs=out_spec,
        compiler_params=pltpu.CompilerParams(
            dimension_semantics=("parallel",),
            vmem_limit_bytes=32 * 1024 * 1024,
        ),
        cost_estimate=cost,
    )(x, *fused_params)


# --------------------------------------------------------------------------- #
# Pure-JAX reference (original, unfused f32 math) — correctness oracle        #
# --------------------------------------------------------------------------- #
def net_forward_ref(x, params):
    (w_per, b_per, w_wd, b_wd, w_day, b_day, w_mo, b_mo,
     w_pk, b_pk, w_sd, b_sd, w_st, b_st, w_sl, b_sl,
     w1, b1, w2, b2, w3, b3, w4, b4, w5, b5, w6, b6, wf, bf) = params
    sl = lambda a, b: x[:, a:b]
    lin = lambda v, w, b: v @ w + b
    cat1 = jnp.concatenate((
        lin(sl(78, 126), w_per, b_per), lin(sl(71, 78), w_wd, b_wd),
        lin(sl(40, 71), w_day, b_day), lin(sl(28, 40), w_mo, b_mo),
        lin(sl(13, 28), w_pk, b_pk), lin(sl(0, 13), w_sd, b_sd),
        lin(sl(130, 183), w_st, b_st), lin(sl(126, 130), w_sl, b_sl)), axis=1)
    o = jnp.tanh(lin(cat1, w1, b1))
    o = jnp.tanh(lin(o, w2, b2))
    o = jnp.tanh(lin(o, w3, b3))
    o = jnp.concatenate((x[:, 183:], o), axis=1)
    lr = lambda v: jnp.where(v > 0, v, NEG_SLOPE * v)
    o = lr(lin(o, w4, b4))
    o = lr(lin(o, w5, b5))
    o = lr(lin(o, w6, b6))
    return lin(o, wf, bf)


if __name__ == "__main__":
    key = jax.random.PRNGKey(0)
    k_x, k_p = jax.random.split(key)

    B = 256
    x = jax.random.normal(k_x, (B, N_FEAT), jnp.float32)  # 183 features + 5 "rest"
    params = init_params(k_p)
    fused = fuse_params(params)

    # Default block_m with the >=2-step rule -> tm=128, grid=(2,): exercises
    # both the pipelined batch grid and the megacore-friendly split.
    out = net_forward(x, fused)
    jax.block_until_ready(out)

    ref = net_forward_ref(x, params)
    assert out.shape == (B, N_OUT)
    max_err = float(jnp.max(jnp.abs(out - ref)))
    mean_err = float(jnp.mean(jnp.abs(out - ref)))
    # bf16 weight/activation path vs. f32 reference: a few e-3 expected.
    assert max_err < 1e-2 and mean_err < 2e-3, (max_err, mean_err)

    print("KERNEL_OK")
</pallas_src>

<mosaic_0001>
module attributes {stable_mosaic.version = 11 : i64} {
  func.func @net_kernel(%arg0: i32, %arg1: memref<128x188xbf16, #tpu.memory_space<vmem>>, %arg2: memref<188x160xbf16, #tpu.memory_space<vmem>>, %arg3: memref<1x128xf32, #tpu.memory_space<vmem>>, %arg4: memref<128x64xbf16, #tpu.memory_space<vmem>>, %arg5: memref<1x64xf32, #tpu.memory_space<vmem>>, %arg6: memref<64x32xbf16, #tpu.memory_space<vmem>>, %arg7: memref<1x32xf32, #tpu.memory_space<vmem>>, %arg8: memref<32x32xbf16, #tpu.memory_space<vmem>>, %arg9: memref<1x32xf32, #tpu.memory_space<vmem>>, %arg10: memref<32x16xbf16, #tpu.memory_space<vmem>>, %arg11: memref<1x16xf32, #tpu.memory_space<vmem>>, %arg12: memref<16x8xbf16, #tpu.memory_space<vmem>>, %arg13: memref<1x8xf32, #tpu.memory_space<vmem>>, %arg14: memref<8x6xbf16, #tpu.memory_space<vmem>>, %arg15: memref<1x6xf32, #tpu.memory_space<vmem>>, %arg16: memref<128x6xf32, #tpu.memory_space<vmem>>) attributes {dimension_semantics = [#tpu.dimension_semantics<parallel>], iteration_bounds = array<i64: 2>, scalar_prefetch = 0 : i64, scratch_operands = 0 : i64, tpu.core_type = #tpu.core_type<tc>, window_params = [{transform_indices = @transform_0, window_bounds = array<i64: 128, 188>}, {pipeline_mode = #tpu.pipeline_mode<synchronous>, transform_indices = @transform_1, window_bounds = array<i64: 188, 160>}, {pipeline_mode = #tpu.pipeline_mode<synchronous>, transform_indices = @transform_2, window_bounds = array<i64: 1, 128>}, {pipeline_mode = #tpu.pipeline_mode<synchronous>, transform_indices = @transform_3, window_bounds = array<i64: 128, 64>}, {pipeline_mode = #tpu.pipeline_mode<synchronous>, transform_indices = @transform_4, window_bounds = array<i64: 1, 64>}, {pipeline_mode = #tpu.pipeline_mode<synchronous>, transform_indices = @transform_5, window_bounds = array<i64: 64, 32>}, {pipeline_mode = #tpu.pipeline_mode<synchronous>, transform_indices = @transform_6, window_bounds = array<i64: 1, 32>}, {pipeline_mode = #tpu.pipeline_mode<synchronous>, transform_indices = @transform_7, window_bounds = array<i64: 32, 32>}, {pipeline_mode = #tpu.pipeline_mode<synchronous>, transform_indices = @transform_8, window_bounds = array<i64: 1, 32>}, {pipeline_mode = #tpu.pipeline_mode<synchronous>, transform_indices = @transform_9, window_bounds = array<i64: 32, 16>}, {pipeline_mode = #tpu.pipeline_mode<synchronous>, transform_indices = @transform_10, window_bounds = array<i64: 1, 16>}, {pipeline_mode = #tpu.pipeline_mode<synchronous>, transform_indices = @transform_11, window_bounds = array<i64: 16, 8>}, {pipeline_mode = #tpu.pipeline_mode<synchronous>, transform_indices = @transform_12, window_bounds = array<i64: 1, 8>}, {pipeline_mode = #tpu.pipeline_mode<synchronous>, transform_indices = @transform_13, window_bounds = array<i64: 8, 6>}, {pipeline_mode = #tpu.pipeline_mode<synchronous>, transform_indices = @transform_14, window_bounds = array<i64: 1, 6>}, {transform_indices = @transform_15, window_bounds = array<i64: 128, 6>}]} {
    %c0 = arith.constant 0 : index
    %c0_0 = arith.constant 0 : index
    %0 = vector.load %arg1[%c0, %c0_0] : memref<128x188xbf16, #tpu.memory_space<vmem>>, vector<128x188xbf16>
    %c0_1 = arith.constant 0 : index
    %c0_2 = arith.constant 0 : index
    %1 = vector.load %arg2[%c0_1, %c0_2] : memref<188x160xbf16, #tpu.memory_space<vmem>>, vector<188x160xbf16>
    %cst = arith.constant dense<0.000000e+00> : vector<128x160xf32>
    %2 = tpu.matmul %0, %1, %cst {dimension_numbers = #tpu.dot_dimension_numbers<[1], [0], [0], [1], [0, 0, 1, 1], [], []>} : vector<128x188xbf16>, vector<188x160xbf16>, vector<128x160xf32> -> vector<128x160xf32>
    %3 = vector.extract_strided_slice %2 {offsets = [0, 0], sizes = [128, 128], strides = [1, 1]} : vector<128x160xf32> to vector<128x128xf32>
    %c0_3 = arith.constant 0 : index
    %c0_4 = arith.constant 0 : index
    %4 = vector.load %arg3[%c0_3, %c0_4] : memref<1x128xf32, #tpu.memory_space<vmem>>, vector<1x128xf32>
    %5 = vector.broadcast %4 : vector<1x128xf32> to vector<128x128xf32>
    %6 = arith.addf %3, %5 : vector<128x128xf32>
    %7 = math.tanh %6 : vector<128x128xf32>
    %8 = vector.extract_strided_slice %2 {offsets = [0, 128], sizes = [128, 32], strides = [1, 1]} : vector<128x160xf32> to vector<128x32xf32>
    %9 = arith.truncf %7 : vector<128x128xf32> to vector<128x128xbf16>
    %c0_5 = arith.constant 0 : index
    %c0_6 = arith.constant 0 : index
    %10 = vector.load %arg4[%c0_5, %c0_6] : memref<128x64xbf16, #tpu.memory_space<vmem>>, vector<128x64xbf16>
    %cst_7 = arith.constant dense<0.000000e+00> : vector<128x64xf32>
    %11 = tpu.matmul %9, %10, %cst_7 {dimension_numbers = #tpu.dot_dimension_numbers<[1], [0], [0], [1], [0, 0, 1, 1], [], []>} : vector<128x128xbf16>, vector<128x64xbf16>, vector<128x64xf32> -> vector<128x64xf32>
    %c0_8 = arith.constant 0 : index
    %c0_9 = arith.constant 0 : index
    %12 = vector.load %arg5[%c0_8, %c0_9] : memref<1x64xf32, #tpu.memory_space<vmem>>, vector<1x64xf32>
    %13 = vector.broadcast %12 : vector<1x64xf32> to vector<128x64xf32>
    %14 = arith.addf %11, %13 : vector<128x64xf32>
    %15 = math.tanh %14 : vector<128x64xf32>
    %16 = arith.truncf %15 : vector<128x64xf32> to vector<128x64xbf16>
    %c0_10 = arith.constant 0 : index
    %c0_11 = arith.constant 0 : index
    %17 = vector.load %arg6[%c0_10, %c0_11] : memref<64x32xbf16, #tpu.memory_space<vmem>>, vector<64x32xbf16>
    %cst_12 = arith.constant dense<0.000000e+00> : vector<128x32xf32>
    %18 = tpu.matmul %16, %17, %cst_12 {dimension_numbers = #tpu.dot_dimension_numbers<[1], [0], [0], [1], [0, 0, 1, 1], [], []>} : vector<128x64xbf16>, vector<64x32xbf16>, vector<128x32xf32> -> vector<128x32xf32>
    %c0_13 = arith.constant 0 : index
    %c0_14 = arith.constant 0 : index
    %19 = vector.load %arg7[%c0_13, %c0_14] : memref<1x32xf32, #tpu.memory_space<vmem>>, vector<1x32xf32>
    %20 = vector.broadcast %19 : vector<1x32xf32> to vector<128x32xf32>
    %21 = arith.addf %18, %20 : vector<128x32xf32>
    %22 = math.tanh %21 : vector<128x32xf32>
    %23 = arith.truncf %22 : vector<128x32xf32> to vector<128x32xbf16>
    %c0_15 = arith.constant 0 : index
    %c0_16 = arith.constant 0 : index
    %24 = vector.load %arg8[%c0_15, %c0_16] : memref<32x32xbf16, #tpu.memory_space<vmem>>, vector<32x32xbf16>
    %cst_17 = arith.constant dense<0.000000e+00> : vector<128x32xf32>
    %25 = tpu.matmul %23, %24, %cst_17 {dimension_numbers = #tpu.dot_dimension_numbers<[1], [0], [0], [1], [0, 0, 1, 1], [], []>} : vector<128x32xbf16>, vector<32x32xbf16>, vector<128x32xf32> -> vector<128x32xf32>
    %26 = arith.addf %25, %8 : vector<128x32xf32>
    %c0_18 = arith.constant 0 : index
    %c0_19 = arith.constant 0 : index
    %27 = vector.load %arg9[%c0_18, %c0_19] : memref<1x32xf32, #tpu.memory_space<vmem>>, vector<1x32xf32>
    %28 = vector.broadcast %27 : vector<1x32xf32> to vector<128x32xf32>
    %29 = arith.addf %26, %28 : vector<128x32xf32>
    %cst_20 = arith.constant 0.000000e+00 : f32
    %30 = vector.broadcast %cst_20 : f32 to vector<128x32xf32>
    %31 = arith.cmpf ogt, %29, %30 : vector<128x32xf32>
    %cst_21 = arith.constant 0.00999999977 : f32
    %32 = vector.broadcast %cst_21 : f32 to vector<128x32xf32>
    %33 = arith.mulf %32, %29 : vector<128x32xf32>
    %34 = arith.select %31, %29, %33 : vector<128x32xi1>, vector<128x32xf32>
    %35 = arith.truncf %34 : vector<128x32xf32> to vector<128x32xbf16>
    %c0_22 = arith.constant 0 : index
    %c0_23 = arith.constant 0 : index
    %36 = vector.load %arg10[%c0_22, %c0_23] : memref<32x16xbf16, #tpu.memory_space<vmem>>, vector<32x16xbf16>
    %cst_24 = arith.constant dense<0.000000e+00> : vector<128x16xf32>
    %37 = tpu.matmul %35, %36, %cst_24 {dimension_numbers = #tpu.dot_dimension_numbers<[1], [0], [0], [1], [0, 0, 1, 1], [], []>} : vector<128x32xbf16>, vector<32x16xbf16>, vector<128x16xf32> -> vector<128x16xf32>
    %c0_25 = arith.constant 0 : index
    %c0_26 = arith.constant 0 : index
    %38 = vector.load %arg11[%c0_25, %c0_26] : memref<1x16xf32, #tpu.memory_space<vmem>>, vector<1x16xf32>
    %39 = vector.broadcast %38 : vector<1x16xf32> to vector<128x16xf32>
    %40 = arith.addf %37, %39 : vector<128x16xf32>
    %cst_27 = arith.constant 0.000000e+00 : f32
    %41 = vector.broadcast %cst_27 : f32 to vector<128x16xf32>
    %42 = arith.cmpf ogt, %40, %41 : vector<128x16xf32>
    %cst_28 = arith.constant 0.00999999977 : f32
    %43 = vector.broadcast %cst_28 : f32 to vector<128x16xf32>
    %44 = arith.mulf %43, %40 : vector<128x16xf32>
    %45 = arith.select %42, %40, %44 : vector<128x16xi1>, vector<128x16xf32>
    %46 = arith.truncf %45 : vector<128x16xf32> to vector<128x16xbf16>
    %c0_29 = arith.constant 0 : index
    %c0_30 = arith.constant 0 : index
    %47 = vector.load %arg12[%c0_29, %c0_30] : memref<16x8xbf16, #tpu.memory_space<vmem>>, vector<16x8xbf16>
    %cst_31 = arith.constant dense<0.000000e+00> : vector<128x8xf32>
    %48 = tpu.matmul %46, %47, %cst_31 {dimension_numbers = #tpu.dot_dimension_numbers<[1], [0], [0], [1], [0, 0, 1, 1], [], []>} : vector<128x16xbf16>, vector<16x8xbf16>, vector<128x8xf32> -> vector<128x8xf32>
    %c0_32 = arith.constant 0 : index
    %c0_33 = arith.constant 0 : index
    %49 = vector.load %arg13[%c0_32, %c0_33] : memref<1x8xf32, #tpu.memory_space<vmem>>, vector<1x8xf32>
    %50 = vector.broadcast %49 : vector<1x8xf32> to vector<128x8xf32>
    %51 = arith.addf %48, %50 : vector<128x8xf32>
    %cst_34 = arith.constant 0.000000e+00 : f32
    %52 = vector.broadcast %cst_34 : f32 to vector<128x8xf32>
    %53 = arith.cmpf ogt, %51, %52 : vector<128x8xf32>
    %cst_35 = arith.constant 0.00999999977 : f32
    %54 = vector.broadcast %cst_35 : f32 to vector<128x8xf32>
    %55 = arith.mulf %54, %51 : vector<128x8xf32>
    %56 = arith.select %53, %51, %55 : vector<128x8xi1>, vector<128x8xf32>
    %57 = arith.truncf %56 : vector<128x8xf32> to vector<128x8xbf16>
    %c0_36 = arith.constant 0 : index
    %c0_37 = arith.constant 0 : index
    %58 = vector.load %arg14[%c0_36, %c0_37] : memref<8x6xbf16, #tpu.memory_space<vmem>>, vector<8x6xbf16>
    %cst_38 = arith.constant dense<0.000000e+00> : vector<128x6xf32>
    %59 = tpu.matmul %57, %58, %cst_38 {dimension_numbers = #tpu.dot_dimension_numbers<[1], [0], [0], [1], [0, 0, 1, 1], [], []>} : vector<128x8xbf16>, vector<8x6xbf16>, vector<128x6xf32> -> vector<128x6xf32>
    %c0_39 = arith.constant 0 : index
    %c0_40 = arith.constant 0 : index
    %60 = vector.load %arg15[%c0_39, %c0_40] : memref<1x6xf32, #tpu.memory_space<vmem>>, vector<1x6xf32>
    %61 = vector.broadcast %60 : vector<1x6xf32> to vector<128x6xf32>
    %62 = arith.addf %59, %61 : vector<128x6xf32>
    %c0_41 = arith.constant 0 : index
    %c0_42 = arith.constant 0 : index
    %63 = vector.load %arg16[%c0_41, %c0_42] : memref<128x6xf32, #tpu.memory_space<vmem>>, vector<128x6xf32>
    tpu.vector_store %arg16[%c0_41, %c0_42], %62 {strides = array<i32>} : memref<128x6xf32, #tpu.memory_space<vmem>>, vector<128x6xf32>,
    return
  }
  func.func @transform_0(%arg0: i32) -> (i32, i32) {
    %c0_i32 = arith.constant 0 : i32
    %c0_i32_0 = arith.constant 0 : i32
    return %arg0, %c0_i32 : i32, i32
  }
  func.func @transform_1(%arg0: i32) -> (i32, i32) {
    %c0_i32 = arith.constant 0 : i32
    %c0_i32_0 = arith.constant 0 : i32
    %c0_i32_1 = arith.constant 0 : i32
    return %c0_i32, %c0_i32_0 : i32, i32
  }
  func.func @transform_2(%arg0: i32) -> (i32, i32) {
    %c0_i32 = arith.constant 0 : i32
    %c0_i32_0 = arith.constant 0 : i32
    %c0_i32_1 = arith.constant 0 : i32
    return %c0_i32, %c0_i32_0 : i32, i32
  }
  func.func @transform_3(%arg0: i32) -> (i32, i32) {
    %c0_i32 = arith.constant 0 : i32
    %c0_i32_0 = arith.constant 0 : i32
    %c0_i32_1 = arith.constant 0 : i32
    return %c0_i32, %c0_i32_0 : i32, i32
  }
  func.func @transform_4(%arg0: i32) -> (i32, i32) {
    %c0_i32 = arith.constant 0 : i32
    %c0_i32_0 = arith.constant 0 : i32
    %c0_i32_1 = arith.constant 0 : i32
    return %c0_i32, %c0_i32_0 : i32, i32
  }
  func.func @transform_5(%arg0: i32) -> (i32, i32) {
    %c0_i32 = arith.constant 0 : i32
    %c0_i32_0 = arith.constant 0 : i32
    %c0_i32_1 = arith.constant 0 : i32
    return %c0_i32, %c0_i32_0 : i32, i32
  }
  func.func @transform_6(%arg0: i32) -> (i32, i32) {
    %c0_i32 = arith.constant 0 : i32
    %c0_i32_0 = arith.constant 0 : i32
    %c0_i32_1 = arith.constant 0 : i32
    return %c0_i32, %c0_i32_0 : i32, i32
  }
  func.func @transform_7(%arg0: i32) -> (i32, i32) {
    %c0_i32 = arith.constant 0 : i32
    %c0_i32_0 = arith.constant 0 : i32
    %c0_i32_1 = arith.constant 0 : i32
    return %c0_i32, %c0_i32_0 : i32, i32
  }
  func.func @transform_8(%arg0: i32) -> (i32, i32) {
    %c0_i32 = arith.constant 0 : i32
    %c0_i32_0 = arith.constant 0 : i32
    %c0_i32_1 = arith.constant 0 : i32
    return %c0_i32, %c0_i32_0 : i32, i32
  }
  func.func @transform_9(%arg0: i32) -> (i32, i32) {
    %c0_i32 = arith.constant 0 : i32
    %c0_i32_0 = arith.constant 0 : i32
    %c0_i32_1 = arith.constant 0 : i32
    return %c0_i32, %c0_i32_0 : i32, i32
  }
  func.func @transform_10(%arg0: i32) -> (i32, i32) {
    %c0_i32 = arith.constant 0 : i32
    %c0_i32_0 = arith.constant 0 : i32
    %c0_i32_1 = arith.constant 0 : i32
    return %c0_i32, %c0_i32_0 : i32, i32
  }
  func.func @transform_11(%arg0: i32) -> (i32, i32) {
    %c0_i32 = arith.constant 0 : i32
    %c0_i32_0 = arith.constant 0 : i32
    %c0_i32_1 = arith.constant 0 : i32
    return %c0_i32, %c0_i32_0 : i32, i32
  }
  func.func @transform_12(%arg0: i32) -> (i32, i32) {
    %c0_i32 = arith.constant 0 : i32
    %c0_i32_0 = arith.constant 0 : i32
    %c0_i32_1 = arith.constant 0 : i32
    return %c0_i32, %c0_i32_0 : i32, i32
  }
  func.func @transform_13(%arg0: i32) -> (i32, i32) {
    %c0_i32 = arith.constant 0 : i32
    %c0_i32_0 = arith.constant 0 : i32
    %c0_i32_1 = arith.constant 0 : i32
    return %c0_i32, %c0_i32_0 : i32, i32
  }
  func.func @transform_14(%arg0: i32) -> (i32, i32) {
    %c0_i32 = arith.constant 0 : i32
    %c0_i32_0 = arith.constant 0 : i32
    %c0_i32_1 = arith.constant 0 : i32
    return %c0_i32, %c0_i32_0 : i32, i32
  }
  func.func @transform_15(%arg0: i32) -> (i32, i32) {
    %c0_i32 = arith.constant 0 : i32
    %c0_i32_0 = arith.constant 0 : i32
    return %arg0, %c0_i32 : i32, i32
  }
}

</mosaic_0001>

<bundles_post_ra>
// kernel: net_forward.1
= control target key start
LH: loop header
LB: loop body
LE: loop exit
PB: predicated region body
PF: predicated region fallthrough
CT: control target
= control target key end

     0   :  { %s2716_s18 = smov 0   ;;  %s3143_s0 = inlined_call_operand.vmem [shape: bf16[256,188], index: 0, kind: input, shape index: {}]   ;;  %s3144_s1 = inlined_call_operand.vmem [shape: bf16[188,160], index: 1, kind: input, shape index: {}]   ;;  %s3145_s2 = inlined_call_operand.vmem [shape: f32[1,128], index: 2, kind: input, shape index: {}]   ;;  %s3146_s3 = inlined_call_operand.vmem [shape: bf16[128,64], index: 3, kind: input, shape index: {}]   ;;  %s3147_s4 = inlined_call_operand.vmem [shape: f32[1,64], index: 4, kind: input, shape index: {}]   ;;  %s3148_s5 = inlined_call_operand.vmem [shape: bf16[64,32], index: 5, kind: input, shape index: {}]   ;;  %s3149_s6 = inlined_call_operand.vmem [shape: f32[1,32], index: 6, kind: input, shape index: {}]   ;;  %s3150_s7 = inlined_call_operand.vmem [shape: bf16[32,32], index: 7, kind: input, shape index: {}]   ;;  %s3151_s8 = inlined_call_operand.vmem [shape: f32[1,32], index: 8, kind: input, shape index: {}]   ;;  %s3152_s9 = inlined_call_operand.vmem [shape: bf16[32,16], index: 9, kind: input, shape index: {}]   ;;  %s3153_s10 = inlined_call_operand.vmem [shape: f32[1,16], index: 10, kind: input, shape index: {}]   ;;  %s3154_s11 = inlined_call_operand.vmem [shape: bf16[16,8], index: 11, kind: input, shape index: {}]   ;;  %s3155_s12 = inlined_call_operand.vmem [shape: f32[1,8], index: 12, kind: input, shape index: {}]   ;;  %s3156_s13 = inlined_call_operand.vmem [shape: bf16[8,6], index: 13, kind: input, shape index: {}]   ;;  %s3157_s14 = inlined_call_operand.vmem [shape: f32[1,6], index: 14, kind: input, shape index: {}]   ;;  %s3158_s15 = inlined_call_operand.vmem [shape: f32[256,6], index: 15, kind: output, shape index: {}]  }
   0x1 LB: > { %s2118_s19 = sadd.s32 4294967295, %s2634_s18   ;;  %p2122_p0 = scmp.ge.s32.totalorder %s2634_s18, 1  ;;  %s2634_s18 = sphi %s2716_s18, %s25_s18  }
   0x2   : > { %p439_p1 = scmp.lt.s32.totalorder %s2634_s18, 3 }
   0x4   : > { %p440_p2 = pnand %p2122_p0, %p439_p1 }
   0x5   : > { %v2455_v0 = vld [vmem:[%s3144_s1 + $0x4] ss:$8 sps:$4 sm:$0xff] (!%p440_p2)   ;;  %s2123_s22 = sshll.u32 (!%p440_p2), %s2118_s19, 4  ;;  %v2457_v1 = vld [vmem:[%s3144_s1] ss:$8 sps:$4 sm:$0xff] (!%p440_p2)   ;;  %vm732_vm0 = vcmask (!%p440_p2), 490496  }
   0x6   : > { %443 = sbr.rel (%p440_p2) target bundleno = 1690 (0x69a), region = 80  ;;  %764 = vmatprep.subr.bf16.mxu0 (!%p440_p2), %v2455_v0  ;;  %v2458_v2 = vld [vmem:[%s3144_s1 + $0x14] ss:$8 sps:$4 sm:$0xff] (!%p440_p2)   ;;  %v2460_v3 = vld [vmem:[%s3144_s1 + $0x10] ss:$8 sps:$4 sm:$0xff] (!%p440_p2)   ;;  %p489_p3 = scmp.lt.s32.totalorder (!%p440_p2), %s2123_s22, 31 }
   0x7   : > { %765 = vmatpush1.bf16.msra.mxu0 (!%p440_p2), %v2457_v1  ;;  %v2461_v4 = vld [vmem:[%s3144_s1 + $0x24] ss:$8 sps:$4 sm:$0xff] (!%p440_p2)   ;;  %v2463_v5 = vld [vmem:[%s3144_s1 + $0x20] ss:$8 sps:$4 sm:$0xff] (!%p440_p2)   ;;  %v2464_v6 = vld [vmem:[%s3144_s1 + $0x34] ss:$8 sps:$4 sm:$0xff] (!%p440_p2)  }
   0x8   : > { %766 = vmatprep.subr.bf16.mxu0 (!%p440_p2), %v2458_v2  ;;  %v2466_v7 = vld [vmem:[%s3144_s1 + $0x30] ss:$8 sps:$4 sm:$0xff] (!%p440_p2)   ;;  %v2467_v8 = vld [vmem:[%s3144_s1 + $0x44] ss:$8 sps:$4 sm:$0xff] (!%p440_p2)   ;;  %v2469_v9 = vld [vmem:[%s3144_s1 + $0x40] ss:$8 sps:$4 sm:$0xff] (!%p440_p2)  }
   0x9   : > { %v2470_v10 = vld [vmem:[%s3144_s1 + $0x54] ss:$8 sps:$4 sm:$0xff] (!%p440_p2)   ;;  %v2472_v12 = vld [vmem:[%s3144_s1 + $0x50] ss:$8 sps:$4 sm:$0xff] (!%p440_p2)   ;;  %v2473_v13 = vld [vmem:[%s3144_s1 + $0x64] ss:$8 sps:$4 sm:$0xff] (!%p440_p2)  }
   0xa   : > { %v2475_v14 = vld [vmem:[%s3144_s1 + $0x60] ss:$8 sps:$4 sm:$0xff] (!%p440_p2)   ;;  %v2476_v15 = vld [vmem:[%s3144_s1 + $0x74] ss:$8 sps:$4 sm:$0xff] (!%p440_p2)   ;;  %v2478_v16 = vld [vmem:[%s3144_s1 + $0x70] ss:$8 sps:$4 sm:$0xff] (!%p440_p2)  }
   0xb   : > { %767 = vmatpush1.bf16.msra.mxu0 (!%p440_p2), %v2460_v3  ;;  %v2479_v17 = vld [vmem:[%s3144_s1 + $0x84] ss:$8 sps:$4 sm:$0xff] (!%p440_p2)   ;;  %v2481_v20 = vld [vmem:[%s3144_s1 + $0x80] ss:$8 sps:$4 sm:$0xff] (!%p440_p2)   ;;  %v2482_v21 = vld [vmem:[%s3144_s1 + $0x94] ss:$8 sps:$4 sm:$0xff] (!%p440_p2)  }
   0xc   : > { %768 = vmatprep.subr.bf16.mxu0 (!%p440_p2), %v2461_v4  ;;  %v2515_v18 = vld [vmem:[%s3146_s3] sm:$0xff] (!%p440_p2)   ;;  %v2516_v19 = vld [vmem:[%s3146_s3 + $0x8] sm:$0xff] (!%p440_p2)   ;;  %v2484_v22 = vld [vmem:[%s3144_s1 + $0x90] ss:$8 sps:$4 sm:$0xff] (!%p440_p2)   ;;  %vm757_vm1 = vcmask (!%p440_p2), 1045504   ;;  %vm1155_vm2 = vcmask (!%p440_p2), 523264  }
   0xd   : > { %s3160_s22 = smov (!%p489_p3, %s2123_s22), 31  ;;  %2310 = vmatprep.subr.bf16.mxu1 %v2515_v18  ;;  %v2485_v23 = vld [vmem:[%s3144_s1 + $0xa4] ss:$8 sps:$4 sm:$0xff]   ;;  %v2487_v24 = vld [vmem:[%s3144_s1 + $0xa0] ss:$8 sps:$4 sm:$0xff]   ;;  %v2517_v43 = vld [vmem:[%s3146_s3 + $0x10] sm:$0xff]  }
   0xe   : > { %s2243_s24 = sshll.u32 %s3160_s22, 3  ;;  %2311 = vmatpush3.bf16.msra.mxu1 %v2515_v18  ;;  %v2488_v25 = vld [vmem:[%s3144_s1 + $0xb4] ss:$8 sps:$4 sm:$0x3f]   ;;  %v2519_v45 = vld [vmem:[%s3146_s3 + $0x20] sm:$0xff]   ;;  %v2520_v46 = vld [vmem:[%s3146_s3 + $0x28] sm:$0xff]  }
   0xf   : > { %769 = vmatpush1.bf16.msra.mxu0 %v2463_v5  ;;  %s2759_s29 = scalar_lea.vmem %s3143_s0, %s2243_s24  ;;  %2312 = vmatprep.subr.bf16.mxu1 %v2516_v19  ;;  %v2490_v26 = vld [vmem:[%s3144_s1 + $0xb0] ss:$8 sps:$4 sm:$0x3f]   ;;  %v2857_v49 = vld [vmem:[%s3145_s2] ss:$0 sm:$0xff]  ;;  %vm1317_vm3 = vcmask 261120   ;;  %s3106_s16 = scalar_lea.vmem %s3158_s15, %s2243_s24 }
  0x10   : > { %770 = vmatprep.subr.bf16.mxu0 %v2464_v6  ;;  %v2493_v11 = vld [vmem:[%s2759_s29 + $0x4] ss:$8 sps:$4 sm:$0xff]   ;;  %v759_v27 = vsel %vm757_vm1, %v2490_v26, 0  ;;  %v2491_v28 = vld [vmem:[%s2759_s29] ss:$8 sps:$4 sm:$0xff]   ;;  %v2518_v44 = vld [vmem:[%s3146_s3 + $0x18] sm:$0xff]  }
  0x11   : > { %2169 = vmatprep.mubr.msk.bf16.mxu0 %vm732_vm0, %v2493_v11  ;;  %v2494_v29 = vld [vmem:[%s2759_s29 + $0x14] ss:$8 sps:$4 sm:$0xff]   ;;  %v2496_v30 = vld [vmem:[%s2759_s29 + $0x10] ss:$8 sps:$4 sm:$0xff]   ;;  %v2497_v31 = vld [vmem:[%s2759_s29 + $0x24] ss:$8 sps:$4 sm:$0xff]  }
  0x12   : > { %2313 = vmatpush3.bf16.msra.mxu1 %v2516_v19  ;;  %v2499_v32 = vld [vmem:[%s2759_s29 + $0x20] ss:$8 sps:$4 sm:$0xff]   ;;  %v2500_v33 = vld [vmem:[%s2759_s29 + $0x34] ss:$8 sps:$4 sm:$0xff]   ;;  %v2502_v34 = vld [vmem:[%s2759_s29 + $0x30] ss:$8 sps:$4 sm:$0xff]  }
  0x13   : > { %771 = vmatpush1.bf16.msra.mxu0 %v2466_v7  ;;  %v2503_v35 = vld [vmem:[%s2759_s29 + $0x44] ss:$8 sps:$4 sm:$0xff]   ;;  %v2505_v36 = vld [vmem:[%s2759_s29 + $0x40] ss:$8 sps:$4 sm:$0xff]   ;;  %v2506_v37 = vld [vmem:[%s2759_s29 + $0x54] ss:$8 sps:$4 sm:$0xff]   ;;  %2314 = vmatprep.subr.bf16.mxu1 %v2517_v43 }
  0x14   : > { %772 = vmatprep.subr.bf16.mxu0 %v2467_v8  ;;  %v2508_v38 = vld [vmem:[%s2759_s29 + $0x50] ss:$8 sps:$4 sm:$0xff]   ;;  %v2509_v39 = vld [vmem:[%s2759_s29 + $0x64] ss:$8 sps:$4 sm:$0xff]   ;;  %v2511_v40 = vld [vmem:[%s2759_s29 + $0x60] ss:$8 sps:$4 sm:$0xff]  }
  0x15   : > { %v2512_v41 = vld [vmem:[%s2759_s29 + $0x74] ss:$8 sps:$4 sm:$0xff]   ;;  %v2514_v42 = vld [vmem:[%s2759_s29 + $0x70] ss:$8 sps:$4 sm:$0xff]  }
  0x16   : > { %2315 = vmatpush3.bf16.msra.mxu1 %v2517_v43  ;;  %v2521_v47 = vld [vmem:[%s3146_s3 + $0x30] sm:$0xff]   ;;  %v2522_v48 = vld [vmem:[%s3146_s3 + $0x38] sm:$0xff]  }
  0x17   : > { %773 = vmatpush1.bf16.msra.mxu0 %v2469_v9  ;;  %2316 = vmatprep.subr.bf16.mxu1 %v2518_v44 }
  0x18   : > { %774 = vmatprep.subr.bf16.mxu0 %v2470_v10 }
  0x1a   : > { %2317 = vmatpush3.bf16.msra.mxu1 %v2518_v44 }
  0x1b   : > { %775 = vmatpush1.bf16.msra.mxu0 %v2472_v12  ;;  %2318 = vmatprep.subr.bf16.mxu1 %v2519_v45 }
  0x1c   : > { %776 = vmatprep.subr.bf16.mxu0 %v2473_v13 }
  0x1e   : > { %2319 = vmatpush3.bf16.msra.mxu1 %v2519_v45 }
  0x1f   : > { %777 = vmatpush1.bf16.msra.mxu0 %v2475_v14  ;;  %2320 = vmatprep.subr.bf16.mxu1 %v2520_v46 }
  0x20   : > { %778 = vmatprep.subr.bf16.mxu0 %v2476_v15 }
  0x22   : > { %2321 = vmatpush3.bf16.msra.mxu1 %v2520_v46 }
  0x23   : > { %779 = vmatpush1.bf16.msra.mxu0 %v2478_v16  ;;  %2322 = vmatprep.subr.bf16.mxu1 %v2521_v47 }
  0x24   : > { %780 = vmatprep.subr.bf16.mxu0 %v2479_v17 }
  0x26   : > { %2323 = vmatpush3.bf16.msra.mxu1 %v2521_v47 }
  0x27   : > { %781 = vmatpush1.bf16.msra.mxu0 %v2481_v20  ;;  %2324 = vmatprep.subr.bf16.mxu1 %v2522_v48 }
  0x28   : > { %782 = vmatprep.subr.bf16.mxu0 %v2482_v21 }
  0x2a   : > { %2325 = vmatpush3.bf16.msra.mxu1 %v2522_v48 }
  0x2b   : > { %783 = vmatpush1.bf16.msra.mxu0 %v2484_v22 }
  0x2c   : > { %784 = vmatprep.subr.bf16.mxu0 %v2485_v23 }
  0x2f   : > { %785 = vmatpush1.bf16.msra.mxu0 %v2487_v24 }
  0x30   : > { %2168 = vmatprep.subr.msk.bf16.mxu0 %vm757_vm1, %v2488_v25 }
  0x33   : > { %787 = vmatpush1.bf16.msra.mxu0 %v759_v27 }
  0x36   : > { %797 = vmatmul.mubr.bf16.vlgmr.msra.gmra.mrb[0].mxu0 %v2491_v28 }
  0x37   : > { %2170 = vmatprep.mubr.msk.bf16.mxu0 %vm732_vm0, %v2494_v29 }
  0x3e   : > { %807 = vmatmul.mubr.bf16.gmra.mrb[4].mxu0 %v2496_v30 }
  0x3f   : > { %2171 = vmatprep.mubr.msk.bf16.mxu0 %vm732_vm0, %v2497_v31 }
  0x46   : > { %817 = vmatmul.mubr.bf16.gmra.mrb[8].mxu0 %v2499_v32 }
  0x47   : > { %2172 = vmatprep.mubr.msk.bf16.mxu0 %vm732_vm0, %v2500_v33 }
  0x4e   : > { %827 = vmatmul.mubr.bf16.gmra.mrb[12].mxu0 %v2502_v34 }
  0x4f   : > { %2173 = vmatprep.mubr.msk.bf16.mxu0 %vm732_vm0, %v2503_v35 }
  0x56   : > { %837 = vmatmul.mubr.bf16.gmra.mrb[16].mxu0 %v2505_v36 }
  0x57   : > { %2174 = vmatprep.mubr.msk.bf16.mxu0 %vm732_vm0, %v2506_v37 }
  0x5e   : > { %847 = vmatmul.mubr.bf16.gmra.mrb[20].mxu0 %v2508_v38 }
  0x5f   : > { %2175 = vmatprep.mubr.msk.bf16.mxu0 %vm732_vm0, %v2509_v39 }
  0x66   : > { %857 = vmatmul.mubr.bf16.gmra.mrb[24].mxu0 %v2511_v40 }
  0x67   : > { %2176 = vmatprep.mubr.msk.bf16.mxu0 %vm732_vm0, %v2512_v41 }
  0x6e   : > { %867 = vmatmul.mubr.bf16.gmra.mrb[28].mxu0 %v2514_v42 }
 0x109   : > { %v798_v50 = vpop.f32.mrb[0].mxu0 }
 0x10a   : > { %v884_v51 = vadd.f32 %v2857_v49, %v798_v50  ;;  %v2860_v52 = vpop.f32.mrb[1].mxu0 }
 0x10b   : > { %v802_v53 = vpop.f32.mrb[2].mxu0 }
 0x10c   : > { %v885_v54 = vadd.f32 %v2857_v49, %v802_v53  ;;  %v2863_v55 = vpop.f32.mrb[3].mxu0  ;;  %2532 = vtanh.f32 %v884_v51 }
 0x10e   : > { %2534 = vtanh.f32 %v885_v54 }
 0x111   : > { %v808_v56 = vpop.f32.mrb[4].mxu0 }
 0x112   : > { %v886_v57 = vadd.f32 %v2857_v49, %v808_v56  ;;  %v2866_v58 = vpop.f32.mrb[5].mxu0 }
 0x113   : > { %v812_v59 = vpop.f32.mrb[6].mxu0 }
 0x114   : > { %v887_v60 = vadd.f32 %v2857_v49, %v812_v59  ;;  %v2869_v61 = vpop.f32.mrb[7].mxu0  ;;  %2536 = vtanh.f32 %v886_v57 }
 0x116   : > { %2538 = vtanh.f32 %v887_v60  ;;  %v2533_v62 = vpop.eup %2532 }
 0x118   : > { %v2535_v63 = vpop.eup %2534 }
 0x119   : > { %v818_v0 = vpop.f32.mrb[8].mxu0  ;;  %v916_v1 = vpack.c.bf16 %v2535_v63, %v2533_v62  ;;  %v2523_v63 = vld [vmem:[%s3148_s5] sm:$0xff]  }
 0x11a   : > { %v888_v2 = vadd.f32 %v2857_v49, %v818_v0  ;;  %v2872_v3 = vpop.f32.mrb[9].mxu0  ;;  %2342 = vmatprep.subr.bf16.mxu1 %v2523_v63  ;;  %v2525_v0 = vld [vmem:[%s3148_s5 + $0x10] sm:$0xff]  }
 0x11b   : > { %v822_v4 = vpop.f32.mrb[10].mxu0  ;;  %2326 = vmatprep.mubr.bf16.mxu1 %v916_v1  ;;  %v2526_v1 = vld [vmem:[%s3148_s5 + $0x18] sm:$0xff]  }
 0x11c   : > { %v889_v5 = vadd.f32 %v2857_v49, %v822_v4  ;;  %v2875_v6 = vpop.f32.mrb[11].mxu0  ;;  %2540 = vtanh.f32 %v888_v2  ;;  %v2922_v2 = vld [vmem:[%s3147_s4] ss:$0 sm:$0xff] }
 0x11e   : > { %2542 = vtanh.f32 %v889_v5  ;;  %v2537_v7 = vpop.eup %2536 }
 0x120   : > { %v2539_v8 = vpop.eup %2538 }
 0x121   : > { %v828_v9 = vpop.f32.mrb[12].mxu0  ;;  %v917_v10 = vpack.c.bf16 %v2539_v8, %v2537_v7 }
 0x122   : > { %v890_v11 = vadd.f32 %v2857_v49, %v828_v9  ;;  %v2878_v12 = vpop.f32.mrb[13].mxu0 }
 0x123   : > { %v832_v13 = vpop.f32.mrb[14].mxu0  ;;  %2327 = vmatmul.mubr.bf16.vlgmr.msra.gmra.mrb[0].mxu1 %v917_v10 }
 0x124   : > { %v891_v14 = vadd.f32 %v2857_v49, %v832_v13  ;;  %v2881_v15 = vpop.f32.mrb[15].mxu0  ;;  %2544 = vtanh.f32 %v890_v11  ;;  %2343 = vmatpush3.bf16.msra.mxu1 %v2523_v63 }
 0x126   : > { %2546 = vtanh.f32 %v891_v14  ;;  %v2541_v16 = vpop.eup %2540 }
 0x128   : > { %v2543_v17 = vpop.eup %2542 }
 0x129   : > { %v838_v18 = vpop.f32.mrb[16].mxu0  ;;  %v918_v19 = vpack.c.bf16 %v2543_v17, %v2541_v16 }
 0x12a   : > { %v892_v20 = vadd.f32 %v2857_v49, %v838_v18  ;;  %v2884_v21 = vpop.f32.mrb[17].mxu0 }
 0x12b   : > { %v842_v22 = vpop.f32.mrb[18].mxu0  ;;  %2330 = vmatprep.mubr.bf16.mxu1 %v918_v19 }
 0x12c   : > { %v893_v23 = vadd.f32 %v2857_v49, %v842_v22  ;;  %v2887_v24 = vpop.f32.mrb[19].mxu0  ;;  %2548 = vtanh.f32 %v892_v20 }
 0x12e   : > { %2550 = vtanh.f32 %v893_v23  ;;  %v2545_v25 = vpop.eup %2544 }
 0x130   : > { %v2547_v26 = vpop.eup %2546 }
 0x131   : > { %v848_v27 = vpop.f32.mrb[20].mxu0  ;;  %v919_v28 = vpack.c.bf16 %v2547_v26, %v2545_v25 }
 0x132   : > { %v894_v29 = vadd.f32 %v2857_v49, %v848_v27  ;;  %v2890_v30 = vpop.f32.mrb[21].mxu0 }
 0x133   : > { %v852_v31 = vpop.f32.mrb[22].mxu0  ;;  %2331 = vmatmul.mubr.bf16.gmra.mrb[4].mxu1 %v919_v28 }
 0x134   : > { %v895_v32 = vadd.f32 %v2857_v49, %v852_v31  ;;  %v2893_v33 = vpop.f32.mrb[23].mxu0  ;;  %2552 = vtanh.f32 %v894_v29 }
 0x136   : > { %2554 = vtanh.f32 %v895_v32  ;;  %v2549_v34 = vpop.eup %2548 }
 0x138   : > { %v2551_v35 = vpop.eup %2550 }
 0x139   : > { %v858_v36 = vpop.f32.mrb[24].mxu0  ;;  %v920_v37 = vpack.c.bf16 %v2551_v35, %v2549_v34 }
 0x13a   : > { %v896_v38 = vadd.f32 %v2857_v49, %v858_v36  ;;  %v2896_v39 = vpop.f32.mrb[25].mxu0 }
 0x13b   : > { %v862_v40 = vpop.f32.mrb[26].mxu0  ;;  %2334 = vmatprep.mubr.bf16.mxu1 %v920_v37 }
 0x13c   : > { %v897_v41 = vadd.f32 %v2857_v49, %v862_v40  ;;  %v2899_v42 = vpop.f32.mrb[27].mxu0  ;;  %2556 = vtanh.f32 %v896_v38 }
 0x13e   : > { %2558 = vtanh.f32 %v897_v41  ;;  %v2553_v43 = vpop.eup %2552 }
 0x140   : > { %v2555_v44 = vpop.eup %2554 }
 0x141   : > { %v868_v45 = vpop.f32.mrb[28].mxu0  ;;  %v921_v46 = vpack.c.bf16 %v2555_v44, %v2553_v43 }
 0x142   : > { %v898_v47 = vadd.f32 %v2857_v49, %v868_v45  ;;  %v2902_v48 = vpop.f32.mrb[29].mxu0 }
 0x143   : > { %v872_v50 = vpop.f32.mrb[30].mxu0  ;;  %2335 = vmatmul.mubr.bf16.gmra.mrb[8].mxu1 %v921_v46 }
 0x144   : > { %v899_v51 = vadd.f32 %v2857_v49, %v872_v50  ;;  %v2905_v53 = vpop.f32.mrb[31].mxu0  ;;  %2560 = vtanh.f32 %v898_v47  ;;  %v2524_v49 = vld [vmem:[%s3148_s5 + $0x8] sm:$0xff]  }
 0x145   : > { %2344 = vmatprep.subr.bf16.mxu1 %v2524_v49 }
 0x146   : > { %2562 = vtanh.f32 %v899_v51  ;;  %v2557_v54 = vpop.eup %2556  ;;  %2345 = vmatpush3.bf16.msra.mxu1 %v2524_v49 }
 0x147   : > { %2346 = vmatprep.subr.bf16.mxu1 %v2525_v0 }
 0x148   : > { %v2559_v56 = vpop.eup %2558 }
 0x149   : > { %v922_v57 = vpack.c.bf16 %v2559_v56, %v2557_v54 }
 0x14a   : > { %2347 = vmatpush3.bf16.msra.mxu1 %v2525_v0 }
 0x14b   : > { %2338 = vmatprep.mubr.bf16.mxu1 %v922_v57  ;;  %2348 = vmatprep.subr.bf16.mxu1 %v2526_v1 }
 0x14e   : > { %v2561_v59 = vpop.eup %2560  ;;  %2349 = vmatpush3.bf16.msra.mxu1 %v2526_v1 }
 0x150   : > { %v2563_v60 = vpop.eup %2562 }
 0x151   : > { %v923_v62 = vpack.c.bf16 %v2563_v60, %v2561_v59 }
 0x153   : > { %2339 = vmatmul.mubr.bf16.gmra.mrb[12].mxu1 %v923_v62 }
 0x1f6   : > { %v2328_v4 = vpop.f32.mrb[0].mxu1 }
 0x1f7   : > { %v1038_v5 = vadd.f32 %v2328_v4, %v2922_v2  ;;  %v1029_v7 = vpop.f32.mrb[1].mxu1 }
 0x1f8   : > { %v1030_v8 = vadd.f32 %v2922_v2, %v1029_v7  ;;  %v2329_v9 = vpop.f32.mrb[2].mxu1 }
 0x1f9   : > { %2564 = vtanh.f32 %v1038_v5  ;;  %v1041_v10 = vadd.f32 %v2329_v9, %v2922_v2  ;;  %v1032_v11 = vpop.f32.mrb[3].mxu1 }
 0x1fa   : > { %2566 = vtanh.f32 %v1030_v8  ;;  %v1033_v13 = vadd.f32 %v2922_v2, %v1032_v11 }
 0x1fb   : > { %2568 = vtanh.f32 %v1041_v10 }
 0x1fc   : > { %2570 = vtanh.f32 %v1033_v13 }
 0x203   : > { %v2565_v14 = vpop.eup %2564 }
 0x204   : > { %v2567_v16 = vpop.eup %2566 }
 0x205   : > { %v2569_v17 = vpop.eup %2568 }
 0x206   : > { %v2571_v18 = vpop.eup %2570  ;;  %v1109_v19 = vpack.c.bf16 %v2569_v17, %v2565_v14  ;;  %v2332_v20 = vpop.f32.mrb[4].mxu1  ;;  %v2529_v17 = vld [vmem:[%s3152_s9] sm:$0xff]  }
 0x207   : > { %v1054_v22 = vadd.f32 %v2332_v20, %v2922_v2  ;;  %v1045_v23 = vpop.f32.mrb[5].mxu1  ;;  %v1108_v25 = vpack.c.bf16 %v2571_v18, %v2567_v16  ;;  %v2527_v16 = vld [vmem:[%s3150_s7] sm:$0xff]   ;;  %2386 = vmatprep.subr.bf16.mxu0 %v2529_v17 }
 0x208   : > { %v1046_v26 = vadd.f32 %v2922_v2, %v1045_v23  ;;  %v2333_v27 = vpop.f32.mrb[6].mxu1  ;;  %2366 = vmatprep.subr.bf16.mxu1 %v2527_v16  ;;  %2387 = vmatpush3.bf16.msra.mxu0 %v2529_v17  ;;  %v2960_v18 = vld [vmem:[%s3149_s6] ss:$0 sm:$0xff] }
 0x209   : > { %2572 = vtanh.f32 %v1054_v22  ;;  %v1057_v28 = vadd.f32 %v2333_v27, %v2922_v2  ;;  %v1048_v29 = vpop.f32.mrb[7].mxu1  ;;  %2350 = vmatprep.mubr.msk.bf16.mxu1 %vm1155_vm2, %v1108_v25 }
 0x20a   : > { %2574 = vtanh.f32 %v1046_v26  ;;  %v1049_v31 = vadd.f32 %v2922_v2, %v1048_v29  ;;  %2351 = vmatmul.mubr.msk.bf16.vlgmr.msra.gmra.mrb[16].mxu1 %vm1155_vm2, %v1109_v19 }
 0x20b   : > { %2576 = vtanh.f32 %v1057_v28  ;;  %2367 = vmatpush3.bf16.msra.mxu1 %v2527_v16 }
 0x20c   : > { %2578 = vtanh.f32 %v1049_v31 }
 0x213   : > { %v2573_v32 = vpop.eup %2572 }
 0x214   : > { %v2575_v34 = vpop.eup %2574 }
 0x215   : > { %v2577_v35 = vpop.eup %2576 }
 0x216   : > { %v2579_v36 = vpop.eup %2578  ;;  %v2336_v37 = vpop.f32.mrb[8].mxu1  ;;  %v1111_v38 = vpack.c.bf16 %v2577_v35, %v2573_v32 }
 0x217   : > { %v1070_v40 = vadd.f32 %v2336_v37, %v2922_v2  ;;  %v1061_v41 = vpop.f32.mrb[9].mxu1  ;;  %v1110_v43 = vpack.c.bf16 %v2579_v36, %v2575_v34 }
 0x218   : > { %v1062_v44 = vadd.f32 %v2922_v2, %v1061_v41  ;;  %v2337_v45 = vpop.f32.mrb[10].mxu1 }
 0x219   : > { %2580 = vtanh.f32 %v1070_v40  ;;  %v1073_v46 = vadd.f32 %v2337_v45, %v2922_v2  ;;  %v1064_v47 = vpop.f32.mrb[11].mxu1  ;;  %2354 = vmatprep.mubr.msk.bf16.mxu1 %vm1155_vm2, %v1110_v43 }
 0x21a   : > { %2582 = vtanh.f32 %v1062_v44  ;;  %v1065_v50 = vadd.f32 %v2922_v2, %v1064_v47  ;;  %2355 = vmatmul.mubr.msk.bf16.gmra.mrb[20].mxu1 %vm1155_vm2, %v1111_v38 }
 0x21b   : > { %2584 = vtanh.f32 %v1073_v46 }
 0x21c   : > { %2586 = vtanh.f32 %v1065_v50 }
 0x223   : > { %v2581_v51 = vpop.eup %2580 }
 0x224   : > { %v2583_v54 = vpop.eup %2582 }
 0x225   : > { %v2585_v56 = vpop.eup %2584 }
 0x226   : > { %v2587_v57 = vpop.eup %2586  ;;  %v2340_v59 = vpop.f32.mrb[12].mxu1  ;;  %v1113_v60 = vpack.c.bf16 %v2585_v56, %v2581_v51 }
 0x227   : > { %v1086_v62 = vadd.f32 %v2340_v59, %v2922_v2  ;;  %v1077_v63 = vpop.f32.mrb[13].mxu1  ;;  %v1112_v49 = vpack.c.bf16 %v2587_v57, %v2583_v54 }
 0x228   : > { %v1078_v0 = vadd.f32 %v2922_v2, %v1077_v63  ;;  %v2341_v1 = vpop.f32.mrb[14].mxu1 }
 0x229   : > { %2588 = vtanh.f32 %v1086_v62  ;;  %v1089_v4 = vadd.f32 %v2341_v1, %v2922_v2  ;;  %v1080_v5 = vpop.f32.mrb[15].mxu1  ;;  %2358 = vmatprep.mubr.msk.bf16.mxu1 %vm1155_vm2, %v1112_v49 }
 0x22a   : > { %2590 = vtanh.f32 %v1078_v0  ;;  %v1081_v7 = vadd.f32 %v2922_v2, %v1080_v5  ;;  %2359 = vmatmul.mubr.msk.bf16.gmra.mrb[24].mxu1 %vm1155_vm2, %v1113_v60  ;;  %v2528_v2 = vld [vmem:[%s3150_s7 + $0x8] sm:$0xff]  }
 0x22b   : > { %2592 = vtanh.f32 %v1089_v4  ;;  %2368 = vmatprep.subr.bf16.mxu1 %v2528_v2 }
 0x22c   : > { %2594 = vtanh.f32 %v1081_v7  ;;  %2369 = vmatpush3.bf16.msra.mxu1 %v2528_v2 }
 0x22d   : > { %2442 = vmatprep.subr.bf16.mxu1 %v2529_v17 }
 0x233   : > { %v2589_v8 = vpop.eup %2588 }
 0x234   : > { %v2591_v9 = vpop.eup %2590 }
 0x235   : > { %v2593_v10 = vpop.eup %2592 }
 0x236   : > { %v2595_v11 = vpop.eup %2594  ;;  %v1115_v13 = vpack.c.bf16 %v2593_v10, %v2589_v8 }
 0x237   : > { %v1114_v14 = vpack.c.bf16 %v2595_v11, %v2591_v9 }
 0x239   : > { %2362 = vmatprep.mubr.msk.bf16.mxu1 %vm1155_vm2, %v1114_v14 }
 0x23a   : > { %2363 = vmatmul.mubr.msk.bf16.gmra.mrb[28].mxu1 %vm1155_vm2, %v1115_v13 }
 0x2dd   : > { %v2352_v19 = vpop.f32.mrb[16].mxu1 }
 0x2de   : > { %v1223_v20 = vadd.f32 %v2352_v19, %v2960_v18  ;;  %v1214_v22 = vpop.f32.mrb[17].mxu1 }
 0x2df   : > { %v1215_v23 = vadd.f32 %v2960_v18, %v1214_v22  ;;  %v2353_v25 = vpop.f32.mrb[18].mxu1 }
 0x2e0   : > { %2596 = vtanh.f32 %v1223_v20  ;;  %v1226_v26 = vadd.f32 %v2353_v25, %v2960_v18  ;;  %v1217_v27 = vpop.f32.mrb[19].mxu1 }
 0x2e1   : > { %2598 = vtanh.f32 %v1215_v23  ;;  %v1218_v28 = vadd.f32 %v2960_v18, %v1217_v27 }
 0x2e2   : > { %2600 = vtanh.f32 %v1226_v26 }
 0x2e3   : > { %2602 = vtanh.f32 %v1218_v28 }
 0x2ea   : > { %v2597_v29 = vpop.eup %2596 }
 0x2eb   : > { %v2599_v31 = vpop.eup %2598 }
 0x2ec   : > { %v2601_v32 = vpop.eup %2600 }
 0x2ed   : > { %v2603_v34 = vpop.eup %2602  ;;  %v1294_v35 = vpack.c.bf16 %v2601_v32, %v2597_v29  ;;  %v2356_v36 = vpop.f32.mrb[20].mxu1  ;;  %v2992_v32 = vld [vmem:[%s3151_s8] ss:$0 sm:$0xff] }
 0x2ee   : > { %v1239_v37 = vadd.f32 %v2356_v36, %v2960_v18  ;;  %v1230_v38 = vpop.f32.mrb[21].mxu1  ;;  %v1293_v40 = vpack.c.bf16 %v2603_v34, %v2599_v31  ;;  %v2530_v31 = vld [vmem:[%s3152_s9 + $0x8] sm:$0xff]  }
 0x2ef   : > { %v1231_v41 = vadd.f32 %v2960_v18, %v1230_v38  ;;  %v2357_v43 = vpop.f32.mrb[22].mxu1  ;;  %2388 = vmatprep.subr.bf16.mxu0 %v2530_v31 }
 0x2f0   : > { %2604 = vtanh.f32 %v1239_v37  ;;  %v1242_v44 = vadd.f32 %v2357_v43, %v2960_v18  ;;  %v1233_v45 = vpop.f32.mrb[23].mxu1  ;;  %2370 = vmatprep.mubr.msk.bf16.mxu1 %vm1317_vm3, %v1293_v40  ;;  %2389 = vmatpush3.bf16.msra.mxu0 %v2530_v31 }
 0x2f1   : > { %2606 = vtanh.f32 %v1231_v41  ;;  %v1234_v46 = vadd.f32 %v2960_v18, %v1233_v45  ;;  %2371 = vmatmul.mubr.msk.bf16.vlgmr.msra.gmra.mrb[32].mxu1 %vm1317_vm3, %v1294_v35 }
 0x2f2   : > { %2608 = vtanh.f32 %v1242_v44  ;;  %2444 = vmatpush3.bf16.msra.mxu1 %v2529_v17 }
 0x2f3   : > { %2610 = vtanh.f32 %v1234_v46  ;;  %2443 = vmatprep.subr.bf16.mxu1 %v2530_v31 }
 0x2f6   : > { %2445 = vmatpush3.bf16.msra.mxu1 %v2530_v31 }
 0x2fa   : > { %v2605_v47 = vpop.eup %2604 }
 0x2fb   : > { %v2607_v50 = vpop.eup %2606 }
 0x2fc   : > { %v2609_v51 = vpop.eup %2608 }
 0x2fd   : > { %v2611_v54 = vpop.eup %2610  ;;  %v2360_v56 = vpop.f32.mrb[24].mxu1  ;;  %v1296_v57 = vpack.c.bf16 %v2609_v51, %v2605_v47 }
 0x2fe   : > { %v1255_v59 = vadd.f32 %v2360_v56, %v2960_v18  ;;  %v1246_v60 = vpop.f32.mrb[25].mxu1  ;;  %v1295_v62 = vpack.c.bf16 %v2611_v54, %v2607_v50 }
 0x2ff   : > { %v1247_v63 = vadd.f32 %v2960_v18, %v1246_v60  ;;  %v2361_v49 = vpop.f32.mrb[26].mxu1 }
 0x300   : > { %2612 = vtanh.f32 %v1255_v59  ;;  %v1258_v0 = vadd.f32 %v2361_v49, %v2960_v18  ;;  %v1249_v1 = vpop.f32.mrb[27].mxu1  ;;  %2374 = vmatprep.mubr.msk.bf16.mxu1 %vm1317_vm3, %v1295_v62 }
 0x301   : > { %2614 = vtanh.f32 %v1247_v63  ;;  %v1250_v4 = vadd.f32 %v2960_v18, %v1249_v1  ;;  %2375 = vmatmul.mubr.msk.bf16.gmra.mrb[36].mxu1 %vm1317_vm3, %v1296_v57 }
 0x302   : > { %2616 = vtanh.f32 %v1258_v0 }
 0x303   : > { %2618 = vtanh.f32 %v1250_v4 }
 0x30a   : > { %v2613_v5 = vpop.eup %2612 }
 0x30b   : > { %v2615_v7 = vpop.eup %2614 }
 0x30c   : > { %v2617_v8 = vpop.eup %2616 }
 0x30d   : > { %v2619_v9 = vpop.eup %2618  ;;  %v2364_v10 = vpop.f32.mrb[28].mxu1  ;;  %v1298_v11 = vpack.c.bf16 %v2617_v8, %v2613_v5 }
 0x30e   : > { %v1271_v13 = vadd.f32 %v2364_v10, %v2960_v18  ;;  %v1262_v14 = vpop.f32.mrb[29].mxu1  ;;  %v1297_v16 = vpack.c.bf16 %v2619_v9, %v2615_v7 }
 0x30f   : > { %v1263_v2 = vadd.f32 %v2960_v18, %v1262_v14  ;;  %v2365_v17 = vpop.f32.mrb[30].mxu1 }
 0x310   : > { %2620 = vtanh.f32 %v1271_v13  ;;  %v1274_v19 = vadd.f32 %v2365_v17, %v2960_v18  ;;  %v1265_v20 = vpop.f32.mrb[31].mxu1  ;;  %2378 = vmatprep.mubr.msk.bf16.mxu1 %vm1317_vm3, %v1297_v16 }
 0x311   : > { %2622 = vtanh.f32 %v1263_v2  ;;  %v1266_v22 = vadd.f32 %v2960_v18, %v1265_v20  ;;  %2379 = vmatmul.mubr.msk.bf16.gmra.mrb[40].mxu1 %vm1317_vm3, %v1298_v11 }
 0x312   : > { %2624 = vtanh.f32 %v1274_v19 }
 0x313   : > { %2626 = vtanh.f32 %v1266_v22 }
 0x31a   : > { %v2621_v23 = vpop.eup %2620 }
 0x31b   : > { %v2623_v25 = vpop.eup %2622 }
 0x31c   : > { %v2625_v26 = vpop.eup %2624 }
 0x31d   : > { %v2627_v27 = vpop.eup %2626  ;;  %v1300_v28 = vpack.c.bf16 %v2625_v26, %v2621_v23 }
 0x31e   : > { %v1299_v29 = vpack.c.bf16 %v2627_v27, %v2623_v25 }
 0x320   : > { %2382 = vmatprep.mubr.msk.bf16.mxu1 %vm1317_vm3, %v1299_v29 }
 0x321   : > { %2383 = vmatmul.mubr.msk.bf16.gmra.mrb[44].mxu1 %vm1317_vm3, %v1300_v28 }
 0x3c4   : > { %v2372_v18 = vpop.f32.mrb[32].mxu1 }
 0x3c5   : > { %v1385_v34 = vadd.f32 %v2372_v18, %v2866_v58  ;;  %v1376_v35 = vpop.f32.mrb[33].mxu1 }
 0x3c6   : > { %v1377_v36 = vadd.f32 %v1376_v35, %v2860_v52  ;;  %v2373_v37 = vpop.f32.mrb[34].mxu1 }
 0x3c7   : > { %v1448_v38 = vadd.f32 %v2992_v32, %v1385_v34  ;;  %v1388_v40 = vadd.f32 %v2373_v37, %v2869_v61  ;;  %v1379_v41 = vpop.f32.mrb[35].mxu1 }
 0x3c8   : > { %v1446_v43 = vadd.f32 %v2992_v32, %v1377_v36  ;;  %v1380_v44 = vadd.f32 %v1379_v41, %v2863_v55 }
 0x3c9   : > { %v1480_v45 = vmul.f32 0.01, %v1448_v38  ;;  %v1449_v46 = vadd.f32 %v2992_v32, %v1388_v40  ;;  %vm1464_vm4 = vcmp.gt.f32.partialorder %v1448_v38, 0.0 }
 0x3ca   : > { %v1478_v47 = vmul.f32 0.01, %v1446_v43  ;;  %v1447_v58 = vadd.f32 %v2992_v32, %v1380_v44  ;;  %vm1462_vm5 = vcmp.gt.f32.partialorder %v1446_v43, 0.0 }
 0x3cb   : > { %vm1465_vm6 = vcmp.gt.f32.partialorder %v1449_v46, 0.0  ;;  %v1481_v52 = vmul.f32 0.01, %v1449_v46  ;;  %v1496_v51 = vsel %vm1464_vm4, %v1448_v38, %v1480_v45 }
 0x3cc   : > { %vm1463_vm7 = vcmp.gt.f32.partialorder %v1447_v58, 0.0  ;;  %v1479_v50 = vmul.f32 0.01, %v1447_v58  ;;  %v1494_v61 = vsel %vm1462_vm5, %v1446_v43, %v1478_v47 }
 0x3cd   : > { %v1497_v54 = vsel %vm1465_vm6, %v1449_v46, %v1481_v52 }
 0x3ce   : > { %v1511_v56 = vpack.c.bf16 %v1497_v54, %v1496_v51  ;;  %v1495_v57 = vsel %vm1463_vm7, %v1447_v58, %v1479_v50 }
 0x3cf   : > { %v1510_v59 = vpack.c.bf16 %v1495_v57, %v1494_v61 }
 0x3d1   : > { %2390 = vmatprep.mubr.msk.bf16.mxu0 %vm1317_vm3, %v1510_v59 }
 0x3d2   : > { %2391 = vmatmul.mubr.msk.bf16.vlgmr.msra.gmra.mrb[32].mxu0 %vm1317_vm3, %v1511_v56 }
 0x3d4   : > { %v2376_v55 = vpop.f32.mrb[36].mxu1 }
 0x3d5   : > { %v1401_v60 = vadd.f32 %v2376_v55, %v2878_v12  ;;  %v1392_v62 = vpop.f32.mrb[37].mxu1 }
 0x3d6   : > { %v1393_v63 = vadd.f32 %v1392_v62, %v2872_v3  ;;  %v2377_v49 = vpop.f32.mrb[38].mxu1 }
 0x3d7   : > { %v1452_v0 = vadd.f32 %v2992_v32, %v1401_v60  ;;  %v1404_v1 = vadd.f32 %v2377_v49, %v2881_v15  ;;  %v1395_v4 = vpop.f32.mrb[39].mxu1 }
 0x3d8   : > { %v1450_v5 = vadd.f32 %v2992_v32, %v1393_v63  ;;  %v1396_v7 = vadd.f32 %v1395_v4, %v2875_v6 }
 0x3d9   : > { %v1484_v8 = vmul.f32 0.01, %v1452_v0  ;;  %v1453_v9 = vadd.f32 %v2992_v32, %v1404_v1  ;;  %vm1468_vm8 = vcmp.gt.f32.partialorder %v1452_v0, 0.0 }
 0x3da   : > { %v1482_v10 = vmul.f32 0.01, %v1450_v5  ;;  %v1451_v12 = vadd.f32 %v2992_v32, %v1396_v7  ;;  %vm1466_vm9 = vcmp.gt.f32.partialorder %v1450_v5, 0.0 }
 0x3db   : > { %vm1469_vm10 = vcmp.gt.f32.partialorder %v1453_v9, 0.0  ;;  %v1485_v3 = vmul.f32 0.01, %v1453_v9  ;;  %v1500_v13 = vsel %vm1468_vm8, %v1452_v0, %v1484_v8  ;;  %vm1733_vm8 = vcmask 130048  }
 0x3dc   : > { %vm1467_vm11 = vcmp.gt.f32.partialorder %v1451_v12, 0.0  ;;  %v1483_v11 = vmul.f32 0.01, %v1451_v12  ;;  %v1498_v15 = vsel %vm1466_vm9, %v1450_v5, %v1482_v10 }
 0x3dd   : > { %v1501_v14 = vsel %vm1469_vm10, %v1453_v9, %v1485_v3 }
 0x3de   : > { %v1499_v16 = vsel %vm1467_vm11, %v1451_v12, %v1483_v11  ;;  %v1513_v2 = vpack.c.bf16 %v1501_v14, %v1500_v13 }
 0x3df   : > { %v1512_v17 = vpack.c.bf16 %v1499_v16, %v1498_v15 }
 0x3e1   : > { %2394 = vmatprep.mubr.msk.bf16.mxu0 %vm1317_vm3, %v1512_v17 }
 0x3e2   : > { %2395 = vmatmul.mubr.msk.bf16.gmra.mrb[36].mxu0 %vm1317_vm3, %v1513_v2 }
 0x3e4   : > { %v2380_v6 = vpop.f32.mrb[40].mxu1 }
 0x3e5   : > { %v1417_v19 = vadd.f32 %v2380_v6, %v2890_v30  ;;  %v1408_v20 = vpop.f32.mrb[41].mxu1 }
 0x3e6   : > { %v1409_v22 = vadd.f32 %v1408_v20, %v2884_v21  ;;  %v2381_v23 = vpop.f32.mrb[42].mxu1 }
 0x3e7   : > { %v1456_v25 = vadd.f32 %v2992_v32, %v1417_v19  ;;  %v1420_v26 = vadd.f32 %v2381_v23, %v2893_v33  ;;  %v1411_v27 = vpop.f32.mrb[43].mxu1 }
 0x3e8   : > { %v1454_v28 = vadd.f32 %v2992_v32, %v1409_v22  ;;  %v1412_v29 = vadd.f32 %v1411_v27, %v2887_v24 }
 0x3e9   : > { %v1488_v31 = vmul.f32 0.01, %v1456_v25  ;;  %v1457_v18 = vadd.f32 %v2992_v32, %v1420_v26  ;;  %vm1472_vm12 = vcmp.gt.f32.partialorder %v1456_v25, 0.0 }
 0x3ea   : > { %v1486_v34 = vmul.f32 0.01, %v1454_v28  ;;  %v1455_v30 = vadd.f32 %v2992_v32, %v1412_v29  ;;  %vm1470_vm13 = vcmp.gt.f32.partialorder %v1454_v28, 0.0 }
 0x3eb   : > { %vm1473_vm14 = vcmp.gt.f32.partialorder %v1457_v18, 0.0  ;;  %v1489_v21 = vmul.f32 0.01, %v1457_v18  ;;  %v1504_v36 = vsel %vm1472_vm12, %v1456_v25, %v1488_v31 }
 0x3ec   : > { %vm1471_vm15 = vcmp.gt.f32.partialorder %v1455_v30, 0.0  ;;  %v1487_v35 = vmul.f32 0.01, %v1455_v30  ;;  %v1502_v33 = vsel %vm1470_vm13, %v1454_v28, %v1486_v34 }
 0x3ed   : > { %v1505_v37 = vsel %vm1473_vm14, %v1457_v18, %v1489_v21 }
 0x3ee   : > { %v1503_v38 = vsel %vm1471_vm15, %v1455_v30, %v1487_v35  ;;  %v1515_v40 = vpack.c.bf16 %v1505_v37, %v1504_v36 }
 0x3ef   : > { %v1514_v41 = vpack.c.bf16 %v1503_v38, %v1502_v33 }
 0x3f1   : > { %2398 = vmatprep.mubr.msk.bf16.mxu0 %vm1317_vm3, %v1514_v41 }
 0x3f2   : > { %2399 = vmatmul.mubr.msk.bf16.gmra.mrb[40].mxu0 %vm1317_vm3, %v1515_v40 }
 0x3f4   : > { %v2384_v24 = vpop.f32.mrb[44].mxu1 }
 0x3f5   : > { %v1433_v43 = vadd.f32 %v2384_v24, %v2902_v48  ;;  %v1424_v44 = vpop.f32.mrb[45].mxu1 }
 0x3f6   : > { %v1425_v45 = vadd.f32 %v1424_v44, %v2896_v39  ;;  %v2385_v46 = vpop.f32.mrb[46].mxu1 }
 0x3f7   : > { %v1460_v47 = vadd.f32 %v2992_v32, %v1433_v43  ;;  %v1436_v58 = vadd.f32 %v2385_v46, %v2905_v53  ;;  %v1427_v52 = vpop.f32.mrb[47].mxu1 }
 0x3f8   : > { %v1458_v50 = vadd.f32 %v2992_v32, %v1425_v45  ;;  %v1428_v51 = vadd.f32 %v1427_v52, %v2899_v42  ;;  %v2531_v42 = vld [vmem:[%s3154_s11] sm:$0xff]  }
 0x3f9   : > { %v1492_v54 = vmul.f32 0.01, %v1460_v47  ;;  %v1461_v61 = vadd.f32 %v2992_v32, %v1436_v58  ;;  %vm1476_vm0 = vcmp.gt.f32.partialorder %v1460_v47, 0.0  ;;  %2406 = vmatprep.subr.bf16.mxu1 %v2531_v42 }
 0x3fa   : > { %v1490_v56 = vmul.f32 0.01, %v1458_v50  ;;  %v1459_v48 = vadd.f32 %v2992_v32, %v1428_v51  ;;  %vm1474_vm1 = vcmp.gt.f32.partialorder %v1458_v50, 0.0  ;;  %v3040_v32 = vld [vmem:[%s3153_s10] ss:$0 sm:$0xff] }
 0x3fb   : > { %vm1477_vm2 = vcmp.gt.f32.partialorder %v1461_v61, 0.0  ;;  %v1493_v39 = vmul.f32 0.01, %v1461_v61  ;;  %v1508_v59 = vsel %vm1476_vm0, %v1460_v47, %v1492_v54 }
 0x3fc   : > { %vm1475_vm4 = vcmp.gt.f32.partialorder %v1459_v48, 0.0  ;;  %v1491_v57 = vmul.f32 0.01, %v1459_v48  ;;  %v1506_v53 = vsel %vm1474_vm1, %v1458_v50, %v1490_v56 }
 0x3fd   : > { %v1509_v55 = vsel %vm1477_vm2, %v1461_v61, %v1493_v39 }
 0x3fe   : > { %v1517_v60 = vpack.c.bf16 %v1509_v55, %v1508_v59  ;;  %v1507_v62 = vsel %vm1475_vm4, %v1459_v48, %v1491_v57 }
 0x3ff   : > { %v1516_v63 = vpack.c.bf16 %v1507_v62, %v1506_v53 }
 0x401   : > { %2402 = vmatprep.mubr.msk.bf16.mxu1 %vm1317_vm3, %v1516_v63 }
 0x402   : > { %2403 = vmatmul.mubr.msk.bf16.vlgmr.msra.gmra.mrb[48].mxu1 %vm1317_vm3, %v1517_v60 }
 0x403   : > { %2407 = vmatpush3.bf16.msra.mxu1 %v2531_v42 }
 0x4a5   : > { %v2392_v49 = vpop.f32.mrb[32].mxu0 }
 0x4a6   : > { %v1608_v0 = vadd.f32 %v2392_v49, %v3040_v32  ;;  %v1599_v1 = vpop.f32.mrb[33].mxu0 }
 0x4a7   : > { %v1600_v4 = vadd.f32 %v3040_v32, %v1599_v1  ;;  %v2393_v5 = vpop.f32.mrb[34].mxu0 }
 0x4a8   : > { %v1680_v7 = vmul.f32 0.01, %v1608_v0  ;;  %v1611_v8 = vadd.f32 %v2393_v5, %v3040_v32  ;;  %v1602_v9 = vpop.f32.mrb[35].mxu0  ;;  %vm1664_vm3 = vcmp.gt.f32.partialorder %v1608_v0, 0.0 }
 0x4a9   : > { %v1678_v10 = vmul.f32 0.01, %v1600_v4  ;;  %v1603_v12 = vadd.f32 %v3040_v32, %v1602_v9  ;;  %vm1662_vm5 = vcmp.gt.f32.partialorder %v1600_v4, 0.0 }
 0x4aa   : > { %vm1665_vm6 = vcmp.gt.f32.partialorder %v1611_v8, 0.0  ;;  %v1681_v3 = vmul.f32 0.01, %v1611_v8  ;;  %v1696_v13 = vsel %vm1664_vm3, %v1608_v0, %v1680_v7 }
 0x4ab   : > { %vm1663_vm7 = vcmp.gt.f32.partialorder %v1603_v12, 0.0  ;;  %v1679_v11 = vmul.f32 0.01, %v1603_v12  ;;  %v1694_v15 = vsel %vm1662_vm5, %v1600_v4, %v1678_v10  ;;  %vm1944_vm5 = vcmask 1043456  }
 0x4ac   : > { %v1697_v14 = vsel %vm1665_vm6, %v1611_v8, %v1681_v3  ;;  %v3072_v3 = vld [vmem:[%s3155_s12] ss:$0 sm:$0xff] }
 0x4ad   : > { %v1711_v16 = vpack.c.bf16 %v1697_v14, %v1696_v13  ;;  %v1695_v2 = vsel %vm1663_vm7, %v1603_v12, %v1679_v11  ;;  %v1911_v12 = vld [vmem:[%s3156_s13] sm:$0xf] }
 0x4ae   : > { %v1710_v17 = vpack.c.bf16 %v1695_v2, %v1694_v15  ;;  %2446 = vmatprep.subr.msk.bf16.mxu0 %vm1944_vm5, %v1911_v12 }
 0x4b0   : > { %2408 = vmatprep.mubr.msk.bf16.mxu1 %vm1733_vm8, %v1710_v17 }
 0x4b1   : > { %2409 = vmatmul.mubr.msk.bf16.vlgmr.msra.gmra.mrb[52].mxu1 %vm1733_vm8, %v1711_v16 }
 0x4b5   : > { %v2396_v6 = vpop.f32.mrb[36].mxu0 }
 0x4b6   : > { %v1624_v19 = vadd.f32 %v2396_v6, %v3040_v32  ;;  %v1615_v20 = vpop.f32.mrb[37].mxu0 }
 0x4b7   : > { %v1616_v22 = vadd.f32 %v3040_v32, %v1615_v20  ;;  %v2397_v23 = vpop.f32.mrb[38].mxu0 }
 0x4b8   : > { %v1684_v25 = vmul.f32 0.01, %v1624_v19  ;;  %v1627_v26 = vadd.f32 %v2397_v23, %v3040_v32  ;;  %v1618_v27 = vpop.f32.mrb[39].mxu0  ;;  %vm1668_vm9 = vcmp.gt.f32.partialorder %v1624_v19, 0.0 }
 0x4b9   : > { %v1682_v28 = vmul.f32 0.01, %v1616_v22  ;;  %v1619_v29 = vadd.f32 %v3040_v32, %v1618_v27  ;;  %vm1666_vm10 = vcmp.gt.f32.partialorder %v1616_v22, 0.0 }
 0x4ba   : > { %vm1669_vm11 = vcmp.gt.f32.partialorder %v1627_v26, 0.0  ;;  %v1685_v31 = vmul.f32 0.01, %v1627_v26  ;;  %v1700_v34 = vsel %vm1668_vm9, %v1624_v19, %v1684_v25 }
 0x4bb   : > { %vm1667_vm12 = vcmp.gt.f32.partialorder %v1619_v29, 0.0  ;;  %v1683_v18 = vmul.f32 0.01, %v1619_v29  ;;  %v1698_v21 = vsel %vm1666_vm10, %v1616_v22, %v1682_v28  ;;  %vm1919_vm10 = vcmask 64512  }
 0x4bc   : > { %v1701_v30 = vsel %vm1669_vm11, %v1627_v26, %v1685_v31 }
 0x4bd   : > { %v1713_v35 = vpack.c.bf16 %v1701_v30, %v1700_v34  ;;  %v1699_v36 = vsel %vm1667_vm12, %v1619_v29, %v1683_v18 }
 0x4be   : > { %v1712_v37 = vpack.c.bf16 %v1699_v36, %v1698_v21 }
 0x4c0   : > { %2412 = vmatprep.mubr.msk.bf16.mxu1 %vm1733_vm8, %v1712_v37 }
 0x4c1   : > { %2413 = vmatmul.mubr.msk.bf16.gmra.mrb[56].mxu1 %vm1733_vm8, %v1713_v35 }
 0x4c5   : > { %v2400_v33 = vpop.f32.mrb[40].mxu0 }
 0x4c6   : > { %v1640_v38 = vadd.f32 %v2400_v33, %v3040_v32  ;;  %v1631_v40 = vpop.f32.mrb[41].mxu0 }
 0x4c7   : > { %v1632_v41 = vadd.f32 %v3040_v32, %v1631_v40  ;;  %v2401_v24 = vpop.f32.mrb[42].mxu0 }
 0x4c8   : > { %v1688_v43 = vmul.f32 0.01, %v1640_v38  ;;  %v1643_v44 = vadd.f32 %v2401_v24, %v3040_v32  ;;  %v1634_v45 = vpop.f32.mrb[43].mxu0  ;;  %vm1672_vm13 = vcmp.gt.f32.partialorder %v1640_v38, 0.0 }
 0x4c9   : > { %v1686_v46 = vmul.f32 0.01, %v1632_v41  ;;  %v1635_v47 = vadd.f32 %v3040_v32, %v1634_v45  ;;  %vm1670_vm14 = vcmp.gt.f32.partialorder %v1632_v41, 0.0 }
 0x4ca   : > { %vm1673_vm15 = vcmp.gt.f32.partialorder %v1643_v44, 0.0  ;;  %v1689_v58 = vmul.f32 0.01, %v1643_v44  ;;  %v1704_v50 = vsel %vm1672_vm13, %v1640_v38, %v1688_v43 }
 0x4cb   : > { %vm1671_vm0 = vcmp.gt.f32.partialorder %v1635_v47, 0.0  ;;  %v1687_v52 = vmul.f32 0.01, %v1635_v47  ;;  %v1702_v54 = vsel %vm1670_vm14, %v1632_v41, %v1686_v46 }
 0x4cc   : > { %v1705_v51 = vsel %vm1673_vm15, %v1643_v44, %v1689_v58 }
 0x4cd   : > { %v1715_v61 = vpack.c.bf16 %v1705_v51, %v1704_v50  ;;  %v1703_v56 = vsel %vm1671_vm0, %v1635_v47, %v1687_v52 }
 0x4ce   : > { %v1714_v48 = vpack.c.bf16 %v1703_v56, %v1702_v54 }
 0x4d0   : > { %2416 = vmatprep.mubr.msk.bf16.mxu1 %vm1733_vm8, %v1714_v48 }
 0x4d1   : > { %2417 = vmatmul.mubr.msk.bf16.gmra.mrb[60].mxu1 %vm1733_vm8, %v1715_v61 }
 0x4d5   : > { %v2404_v39 = vpop.f32.mrb[48].mxu1 }
 0x4d6   : > { %v1656_v57 = vadd.f32 %v2404_v39, %v3040_v32  ;;  %v1647_v59 = vpop.f32.mrb[49].mxu1 }
 0x4d7   : > { %v1648_v55 = vadd.f32 %v3040_v32, %v1647_v59  ;;  %v2405_v53 = vpop.f32.mrb[50].mxu1 }
 0x4d8   : > { %v1692_v60 = vmul.f32 0.01, %v1656_v57  ;;  %v1659_v62 = vadd.f32 %v2405_v53, %v3040_v32  ;;  %v1650_v63 = vpop.f32.mrb[51].mxu1  ;;  %vm1676_vm1 = vcmp.gt.f32.partialorder %v1656_v57, 0.0 }
 0x4d9   : > { %v1690_v42 = vmul.f32 0.01, %v1648_v55  ;;  %v1651_v49 = vadd.f32 %v3040_v32, %v1650_v63  ;;  %vm1674_vm2 = vcmp.gt.f32.partialorder %v1648_v55, 0.0  ;;  %v1946_v32 = vsel %vm1944_vm5, %v1911_v12, 0 }
 0x4da   : > { %vm1677_vm4 = vcmp.gt.f32.partialorder %v1659_v62, 0.0  ;;  %v1693_v0 = vmul.f32 0.01, %v1659_v62  ;;  %v1708_v4 = vsel %vm1676_vm1, %v1656_v57, %v1692_v60  ;;  %2425 = vmatpush3.bf16.msra.mxu0 %v1946_v32 }
 0x4db   : > { %vm1675_vm3 = vcmp.gt.f32.partialorder %v1651_v49, 0.0  ;;  %v1691_v1 = vmul.f32 0.01, %v1651_v49  ;;  %v1706_v7 = vsel %vm1674_vm2, %v1648_v55, %v1690_v42 }
 0x4dc   : > { %v1709_v5 = vsel %vm1677_vm4, %v1659_v62, %v1693_v0 }
 0x4dd   : > { %v1717_v8 = vpack.c.bf16 %v1709_v5, %v1708_v4  ;;  %v1707_v9 = vsel %vm1675_vm3, %v1651_v49, %v1691_v1 }
 0x4de   : > { %v1716_v10 = vpack.c.bf16 %v1707_v9, %v1706_v7 }
 0x4e0   : > { %2420 = vmatprep.mubr.msk.bf16.mxu1 %vm1733_vm8, %v1716_v10 }
 0x4e1   : > { %2421 = vmatmul.mubr.msk.bf16.gmra.mrb[64].mxu1 %vm1733_vm8, %v1717_v8 }
 0x584   : > { %v2410_v11 = vpop.f32.mrb[52].mxu1 }
 0x585   : > { %v1801_v13 = vadd.f32 %v2410_v11, %v3072_v3  ;;  %v1792_v14 = vpop.f32.mrb[53].mxu1 }
 0x586   : > { %v1793_v15 = vadd.f32 %v3072_v3, %v1792_v14  ;;  %v2411_v16 = vpop.f32.mrb[54].mxu1 }
 0x587   : > { %v1873_v2 = vmul.f32 0.01, %v1801_v13  ;;  %v1804_v17 = vadd.f32 %v2411_v16, %v3072_v3  ;;  %v1795_v6 = vpop.f32.mrb[55].mxu1  ;;  %vm1857_vm6 = vcmp.gt.f32.partialorder %v1801_v13, 0.0 }
 0x588   : > { %v1871_v19 = vmul.f32 0.01, %v1793_v15  ;;  %v1796_v20 = vadd.f32 %v3072_v3, %v1795_v6  ;;  %vm1855_vm7 = vcmp.gt.f32.partialorder %v1793_v15, 0.0 }
 0x589   : > { %vm1858_vm8 = vcmp.gt.f32.partialorder %v1804_v17, 0.0  ;;  %v1874_v22 = vmul.f32 0.01, %v1804_v17  ;;  %v1889_v25 = vsel %vm1857_vm6, %v1801_v13, %v1873_v2 }
 0x58a   : > { %vm1856_vm9 = vcmp.gt.f32.partialorder %v1796_v20, 0.0  ;;  %v1872_v23 = vmul.f32 0.01, %v1796_v20  ;;  %v1887_v27 = vsel %vm1855_vm7, %v1793_v15, %v1871_v19  ;;  %vm2045_vm7 = vcmask 48128  }
 0x58b   : > { %v1890_v26 = vsel %vm1858_vm8, %v1804_v17, %v1874_v22 }
 0x58c   : > { %v1904_v28 = vpack.c.bf16 %v1890_v26, %v1889_v25  ;;  %v1888_v29 = vsel %vm1856_vm9, %v1796_v20, %v1872_v23  ;;  %v2232_v20 = vld [vmem:[%s3157_s14] ss:$0 sm:$0xff] }
 0x58d   : > { %v1903_v31 = vpack.c.bf16 %v1888_v29, %v1887_v27 }
 0x58f   : > { %2426 = vmatprep.mubr.msk.bf16.mxu0 %vm1919_vm10, %v1903_v31 }
 0x590   : > { %2427 = vmatmul.mubr.msk.bf16.vlgmr.msra.gmra.mrb[44].mxu0 %vm1919_vm10, %v1904_v28 }
 0x594   : > { %v2414_v18 = vpop.f32.mrb[56].mxu1 }
 0x595   : > { %v1817_v34 = vadd.f32 %v2414_v18, %v3072_v3  ;;  %v1808_v30 = vpop.f32.mrb[57].mxu1 }
 0x596   : > { %v1809_v21 = vadd.f32 %v3072_v3, %v1808_v30  ;;  %v2415_v35 = vpop.f32.mrb[58].mxu1 }
 0x597   : > { %v1877_v36 = vmul.f32 0.01, %v1817_v34  ;;  %v1820_v37 = vadd.f32 %v2415_v35, %v3072_v3  ;;  %v1811_v33 = vpop.f32.mrb[59].mxu1  ;;  %vm1861_vm11 = vcmp.gt.f32.partialorder %v1817_v34, 0.0 }
 0x598   : > { %v1875_v38 = vmul.f32 0.01, %v1809_v21  ;;  %v1812_v40 = vadd.f32 %v3072_v3, %v1811_v33  ;;  %vm1859_vm12 = vcmp.gt.f32.partialorder %v1809_v21, 0.0 }
 0x599   : > { %vm1862_vm13 = vcmp.gt.f32.partialorder %v1820_v37, 0.0  ;;  %v1878_v41 = vmul.f32 0.01, %v1820_v37  ;;  %v1893_v43 = vsel %vm1861_vm11, %v1817_v34, %v1877_v36 }
 0x59a   : > { %vm1860_vm14 = vcmp.gt.f32.partialorder %v1812_v40, 0.0  ;;  %v1876_v24 = vmul.f32 0.01, %v1812_v40  ;;  %v1891_v45 = vsel %vm1859_vm12, %v1809_v21, %v1875_v38 }
 0x59b   : > { %v1894_v44 = vsel %vm1862_vm13, %v1820_v37, %v1878_v41 }
 0x59c   : > { %v1906_v46 = vpack.c.bf16 %v1894_v44, %v1893_v43  ;;  %v1892_v47 = vsel %vm1860_vm14, %v1812_v40, %v1876_v24 }
 0x59d   : > { %v1905_v58 = vpack.c.bf16 %v1892_v47, %v1891_v45 }
 0x59f   : > { %2430 = vmatprep.mubr.msk.bf16.mxu0 %vm1919_vm10, %v1905_v58 }
 0x5a0   : > { %2431 = vmatmul.mubr.msk.bf16.gmra.mrb[48].mxu0 %vm1919_vm10, %v1906_v46 }
 0x5a4   : > { %v2418_v52 = vpop.f32.mrb[60].mxu1 }
 0x5a5   : > { %v1833_v50 = vadd.f32 %v2418_v52, %v3072_v3  ;;  %v1824_v51 = vpop.f32.mrb[61].mxu1 }
 0x5a6   : > { %v1825_v54 = vadd.f32 %v3072_v3, %v1824_v51  ;;  %v2419_v61 = vpop.f32.mrb[62].mxu1 }
 0x5a7   : > { %v1881_v56 = vmul.f32 0.01, %v1833_v50  ;;  %v1836_v48 = vadd.f32 %v2419_v61, %v3072_v3  ;;  %v1827_v39 = vpop.f32.mrb[63].mxu1  ;;  %vm1865_vm15 = vcmp.gt.f32.partialorder %v1833_v50, 0.0 }
 0x5a8   : > { %v1879_v57 = vmul.f32 0.01, %v1825_v54  ;;  %v1828_v59 = vadd.f32 %v3072_v3, %v1827_v39  ;;  %vm1863_vm0 = vcmp.gt.f32.partialorder %v1825_v54, 0.0 }
 0x5a9   : > { %vm1866_vm1 = vcmp.gt.f32.partialorder %v1836_v48, 0.0  ;;  %v1882_v55 = vmul.f32 0.01, %v1836_v48  ;;  %v1897_v60 = vsel %vm1865_vm15, %v1833_v50, %v1881_v56 }
 0x5aa   : > { %vm1864_vm2 = vcmp.gt.f32.partialorder %v1828_v59, 0.0  ;;  %v1880_v53 = vmul.f32 0.01, %v1828_v59  ;;  %v1895_v63 = vsel %vm1863_vm0, %v1825_v54, %v1879_v57 }
 0x5ab   : > { %v1898_v62 = vsel %vm1866_vm1, %v1836_v48, %v1882_v55 }
 0x5ac   : > { %v1908_v42 = vpack.c.bf16 %v1898_v62, %v1897_v60  ;;  %v1896_v49 = vsel %vm1864_vm2, %v1828_v59, %v1880_v53 }
 0x5ad   : > { %v1907_v0 = vpack.c.bf16 %v1896_v49, %v1895_v63 }
 0x5af   : > { %2434 = vmatprep.mubr.msk.bf16.mxu0 %vm1919_vm10, %v1907_v0 }
 0x5b0   : > { %2435 = vmatmul.mubr.msk.bf16.gmra.mrb[52].mxu0 %vm1919_vm10, %v1908_v42 }
 0x5b4   : > { %v2422_v1 = vpop.f32.mrb[64].mxu1 }
 0x5b5   : > { %v1849_v4 = vadd.f32 %v2422_v1, %v3072_v3  ;;  %v1840_v5 = vpop.f32.mrb[65].mxu1 }
 0x5b6   : > { %v1841_v7 = vadd.f32 %v3072_v3, %v1840_v5  ;;  %v2423_v8 = vpop.f32.mrb[66].mxu1 }
 0x5b7   : > { %v1885_v9 = vmul.f32 0.01, %v1849_v4  ;;  %v1852_v10 = vadd.f32 %v2423_v8, %v3072_v3  ;;  %v1843_v12 = vpop.f32.mrb[67].mxu1  ;;  %vm1869_vm4 = vcmp.gt.f32.partialorder %v1849_v4, 0.0 }
 0x5b8   : > { %v1883_v32 = vmul.f32 0.01, %v1841_v7  ;;  %v1844_v11 = vadd.f32 %v3072_v3, %v1843_v12  ;;  %vm1867_vm3 = vcmp.gt.f32.partialorder %v1841_v7, 0.0 }
 0x5b9   : > { %vm1870_vm5 = vcmp.gt.f32.partialorder %v1852_v10, 0.0  ;;  %v1886_v13 = vmul.f32 0.01, %v1852_v10  ;;  %v1901_v15 = vsel %vm1869_vm4, %v1849_v4, %v1885_v9 }
 0x5ba   : > { %vm1868_vm6 = vcmp.gt.f32.partialorder %v1844_v11, 0.0  ;;  %v1884_v14 = vmul.f32 0.01, %v1844_v11  ;;  %v1899_v2 = vsel %vm1867_vm3, %v1841_v7, %v1883_v32 }
 0x5bb   : > { %v1902_v16 = vsel %vm1870_vm5, %v1852_v10, %v1886_v13 }
 0x5bc   : > { %v1910_v17 = vpack.c.bf16 %v1902_v16, %v1901_v15  ;;  %v1900_v6 = vsel %vm1868_vm6, %v1844_v11, %v1884_v14 }
 0x5bd   : > { %v1909_v19 = vpack.c.bf16 %v1900_v6, %v1899_v2 }
 0x5bf   : > { %2438 = vmatprep.mubr.msk.bf16.mxu0 %vm1919_vm10, %v1909_v19 }
 0x5c0   : > { %2439 = vmatmul.mubr.msk.bf16.gmra.mrb[56].mxu0 %vm1919_vm10, %v1910_v17 }
 0x663   : > { %v2428_v3 = vpop.f32.mrb[44].mxu0 }
 0x664   : > { %v1991_v22 = vadd.f32 %v2428_v3, %v2232_v20  ;;  %v1982_v23 = vpop.f32.mrb[45].mxu0 }
 0x665   : > { %v1983_v25 = vadd.f32 %v2232_v20, %v1982_v23  ;;  %v2429_v26 = vpop.f32.mrb[46].mxu0 }
 0x666   : > { %2048 = vst.msk [vmem:[%s3106_s16 + $0x10] sm:$0xff] %vm2045_vm7, %v1991_v22  ;;  %v1994_v27 = vadd.f32 %v2429_v26, %v2232_v20  ;;  %v1985_v28 = vpop.f32.mrb[47].mxu0 }
 0x667   : > { %2046 = vst.msk [vmem:[%s3106_s16] sm:$0xff] %vm2045_vm7, %v1983_v25  ;;  %v1986_v29 = vadd.f32 %v2232_v20, %v1985_v28 }
 0x668   : > { %2049 = vst.msk [vmem:[%s3106_s16 + $0x18] sm:$0xff] %vm2045_vm7, %v1994_v27 }
 0x669   : > { %2047 = vst.msk [vmem:[%s3106_s16 + $0x8] sm:$0xff] %vm2045_vm7, %v1986_v29 }
 0x673   : > { %v2432_v31 = vpop.f32.mrb[48].mxu0 }
 0x674   : > { %v2007_v18 = vadd.f32 %v2432_v31, %v2232_v20  ;;  %v1998_v34 = vpop.f32.mrb[49].mxu0 }
 0x675   : > { %v1999_v30 = vadd.f32 %v2232_v20, %v1998_v34  ;;  %v2433_v21 = vpop.f32.mrb[50].mxu0 }
 0x676   : > { %2052 = vst.msk [vmem:[%s3106_s16 + $0x30] sm:$0xff] %vm2045_vm7, %v2007_v18  ;;  %v2010_v35 = vadd.f32 %v2433_v21, %v2232_v20  ;;  %v2001_v36 = vpop.f32.mrb[51].mxu0 }
 0x677   : > { %2050 = vst.msk [vmem:[%s3106_s16 + $0x20] sm:$0xff] %vm2045_vm7, %v1999_v30  ;;  %v2002_v37 = vadd.f32 %v2232_v20, %v2001_v36 }
 0x678   : > { %2053 = vst.msk [vmem:[%s3106_s16 + $0x38] sm:$0xff] %vm2045_vm7, %v2010_v35 }
 0x679   : > { %2051 = vst.msk [vmem:[%s3106_s16 + $0x28] sm:$0xff] %vm2045_vm7, %v2002_v37 }
 0x683   : > { %v2436_v33 = vpop.f32.mrb[52].mxu0 }
 0x684   : > { %v2023_v38 = vadd.f32 %v2436_v33, %v2232_v20  ;;  %v2014_v40 = vpop.f32.mrb[53].mxu0 }
 0x685   : > { %v2015_v41 = vadd.f32 %v2232_v20, %v2014_v40  ;;  %v2437_v24 = vpop.f32.mrb[54].mxu0 }
 0x686   : > { %2056 = vst.msk [vmem:[%s3106_s16 + $0x50] sm:$0xff] %vm2045_vm7, %v2023_v38  ;;  %v2026_v43 = vadd.f32 %v2437_v24, %v2232_v20  ;;  %v2017_v44 = vpop.f32.mrb[55].mxu0 }
 0x687   : > { %2054 = vst.msk [vmem:[%s3106_s16 + $0x40] sm:$0xff] %vm2045_vm7, %v2015_v41  ;;  %v2018_v45 = vadd.f32 %v2232_v20, %v2017_v44 }
 0x688   : > { %2057 = vst.msk [vmem:[%s3106_s16 + $0x58] sm:$0xff] %vm2045_vm7, %v2026_v43 }
 0x689   : > { %2055 = vst.msk [vmem:[%s3106_s16 + $0x48] sm:$0xff] %vm2045_vm7, %v2018_v45 }
 0x693   : > { %v2440_v46 = vpop.f32.mrb[56].mxu0 }
 0x694   : > { %v2039_v47 = vadd.f32 %v2440_v46, %v2232_v20  ;;  %v2030_v58 = vpop.f32.mrb[57].mxu0 }
 0x695   : > { %v2031_v52 = vadd.f32 %v2232_v20, %v2030_v58  ;;  %v2441_v50 = vpop.f32.mrb[58].mxu0 }
 0x696   : > { %2060 = vst.msk [vmem:[%s3106_s16 + $0x70] sm:$0xff] %vm2045_vm7, %v2039_v47  ;;  %v2042_v51 = vadd.f32 %v2441_v50, %v2232_v20  ;;  %v2033_v54 = vpop.f32.mrb[59].mxu0 }
 0x697   : > { %2058 = vst.msk [vmem:[%s3106_s16 + $0x60] sm:$0xff] %vm2045_vm7, %v2031_v52  ;;  %v2034_v61 = vadd.f32 %v2232_v20, %v2033_v54 }
 0x698   : > { %2061 = vst.msk [vmem:[%s3106_s16 + $0x78] sm:$0xff] %vm2045_vm7, %v2042_v51 }
 0x699   : > { %2059 = vst.msk [vmem:[%s3106_s16 + $0x68] sm:$0xff] %vm2045_vm7, %v2034_v61 }
 0x69a PF: > { %s25_s18 = sadd.s32 1, %s2634_s18  }
 0x69b   : > { %p22_p4 = scmp.ge.s32.totalorder %s25_s18, 4  }
 0x69d   :  { %24 = sbr.rel (!%p22_p4) target bundleno = 1 (0x1), region = 110 }

</bundles_post_ra>
